<compile_context>
chip_gen: v6e
topology: v6e:2x2x1
jax: 0.10.0
libtpu: 0.0.40
codegen_flags: <defaults>
</compile_context>

<pallas_src>
import functools
import math

import jax
import jax.numpy as jnp
from jax import lax
from jax.experimental import pallas as pl
from jax.experimental.pallas import tpu as pltpu

MAX_NUM_CLASS = 2
LN_EPS = 1e-5


# ----------------------------- shared math helpers ---------------------------
def _layernorm(x, g, b):
    mu = jnp.mean(x, axis=-1, keepdims=True)
    var = jnp.mean(jnp.square(x - mu), axis=-1, keepdims=True)
    return (x - mu) * lax.rsqrt(var + LN_EPS) * g + b


def _gelu(x):
    c = math.sqrt(2.0 / math.pi)
    return 0.5 * x * (1.0 + jnp.tanh(c * (x + 0.044715 * x * x * x)))


# ------------------------------ fused forward kernel -------------------------
def _fused_forward_kernel(zs_ref, w_in_ref, b_in_ref, wpe_ref,
                          ln1g_ref, ln1b_ref, wqkv_ref, bqkv_ref,
                          wo_ref, bo_ref, ln2g_ref, ln2b_ref,
                          wfc_ref, bfc_ref, wpr_ref, bpr_ref,
                          lnfg_ref, lnfb_ref, wout_ref, bout_ref,
                          pred_ref, *, n_layer, n_head):
    Bb, T, d_in = zs_ref.shape
    E = w_in_ref.shape[1]
    M = Bb * T
    hd = E // n_head
    scale = 1.0 / math.sqrt(hd)
    f32, bf16 = jnp.float32, jnp.bfloat16

    def mm(a, w):
        # bf16 MXU operands, f32 accumulation (weights already stored bf16).
        return jnp.dot(a.astype(bf16), w, preferred_element_type=f32)

    # ---- read_in + learned position embedding, all Bb*T rows at once ----
    z = zs_ref[...].reshape(M, d_in)
    pos = wpe_ref[...]
    if Bb > 1:
        pos = jnp.concatenate([pos] * Bb, axis=0)              # (M, E)
    x = mm(z, w_in_ref[...]) + b_in_ref[...] + pos              # (M, E) f32

    # ---- masks hoisted out of the layer / batch loops ----
    rows = lax.broadcasted_iota(jnp.int32, (T, T), 0)
    cols = lax.broadcasted_iota(jnp.int32, (T, T), 1)
    causal_f = (rows >= cols).astype(f32)                       # (T, T) 0/1
    causal_h = jnp.concatenate([causal_f] * n_head, axis=0)     # (n_head*T, T)
    lane = lax.broadcasted_iota(jnp.int32, (1, E), 1)
    head_sel = [((lane >= h * hd) & (lane < (h + 1) * hd)).astype(f32)
                for h in range(n_head)]                         # 0/1, (1, E)
    head_qsel = [m * scale for m in head_sel]                   # scale folded in

    for l in range(n_layer):        # static unroll; weights stacked on axis 0
        # ---- causal multi-head self-attention (pre-LN) ----
        xn = _layernorm(x, ln1g_ref[l], ln1b_ref[l]).astype(bf16)
        q = mm(xn, wqkv_ref[l, 0]) + bqkv_ref[l, 0]             # (M, E) f32
        k = mm(xn, wqkv_ref[l, 1]) + bqkv_ref[l, 1]
        v = mm(xn, wqkv_ref[l, 2]) + bqkv_ref[l, 2]

        y_blocks = []
        for b in range(Bb):         # scores / PV stay per batch element
            qb = q[b * T:(b + 1) * T]
            kb = k[b * T:(b + 1) * T].astype(bf16)
            vb = v[b * T:(b + 1) * T].astype(bf16)
            # All heads stacked along sublanes -> one score + one PV matmul.
            # Zeroed lanes contribute exactly 0 to the f32 contraction.
            qm = jnp.concatenate([qb * head_qsel[h] for h in range(n_head)],
                                 axis=0).astype(bf16)           # (n_head*T, E)
            s = lax.dot_general(qm, kb, (((1,), (1,)), ((), ())),
                                preferred_element_type=f32)     # (n_head*T, T)
            s = jnp.where(causal_h > 0.0, s, -1e30)
            s = s - jnp.max(s, axis=-1, keepdims=True)
            p = jnp.exp(s)
            p = p * pl.reciprocal(jnp.sum(p, axis=-1, keepdims=True),
                                  approx=True)
            pv = mm(p, vb)                                      # (n_head*T, E)
            yb = head_sel[0] * pv[0:T]
            for h in range(1, n_head):
                yb = yb + head_sel[h] * pv[h * T:(h + 1) * T]   # (T, E)
            y_blocks.append(yb)
        y = y_blocks[0] if Bb == 1 else jnp.concatenate(y_blocks, axis=0)
        x = x + mm(y, wo_ref[l]) + bo_ref[l]

        # ---- MLP (pre-LN, 4x hidden, tanh GELU) ----
        xn2 = _layernorm(x, ln2g_ref[l], ln2b_ref[l])
        h1 = _gelu(mm(xn2, wfc_ref[l]) + bfc_ref[l])            # (M, 4E)
        x = x + mm(h1, wpr_ref[l]) + bpr_ref[l]

    # ---- final LayerNorm + read_out ----
    xn = _layernorm(x, lnfg_ref[...], lnfb_ref[...])
    pred = mm(xn, wout_ref[...]) + bout_ref[...]                # (M, O)
    pred_ref[...] = pred.reshape(Bb, T, wout_ref.shape[1])


# ------------------------------- python wrapper -------------------------------
def combine(xs, ys):
    """[B,n,d], [B,n] -> interleaved [B,2n,d] (x_i row, then (y_i,0,...,0) row)."""
    B, n, d = xs.shape
    ys_wide = jnp.concatenate(
        [ys[:, :, None], jnp.zeros((B, n, d - 1), xs.dtype)], axis=2)
    return jnp.stack([xs, ys_wide], axis=2).reshape(B, 2 * n, d)


def _bcast(ndim):
    return lambda b: (0,) * ndim


def _choose_batch_tile(B, T, target_rows=128):
    """Largest useful batch tile: aim for >=128 MXU rows per grid step while
    keeping >=2 grid steps so both v7x TensorCores get work."""
    divisors = [d for d in range(1, B + 1) if B % d == 0]
    for d in divisors:                       # smallest tile hitting the row target
        if d * T >= target_rows and B // d >= 2:
            return d
    for d in reversed(divisors):             # else biggest tile leaving >=2 steps
        if B // d >= 2:
            return d
    return B


@functools.partial(jax.jit, static_argnames=("n_head",))
def transformer_forward(xs, ys, params, *, n_head):
    freq, ind = 2, 0
    B, n, d_in = xs.shape
    T = freq * n
    O = params["w_out"].shape[1]
    L = params["ln1_g"].shape[0]
    Bb = _choose_batch_tile(B, T)

    zs = combine(xs, ys)                                          # [B, T, d_in]
    weights = [params["w_in"], params["b_in"], params["wpe"][:T],
               params["ln1_g"], params["ln1_b"],
               params["w_qkv"], params["b_qkv"],
               params["w_o"], params["b_o"],
               params["ln2_g"], params["ln2_b"],
               params["w_fc"], params["b_fc"],
               params["w_pr"], params["b_pr"],
               params["lnf_g"], params["lnf_b"],
               params["w_out"], params["b_out"]]

    in_specs = [pl.BlockSpec((Bb, T, d_in), lambda b: (b, 0, 0))]
    in_specs += [pl.BlockSpec(w.shape, _bcast(w.ndim)) for w in weights]

    pred = pl.pallas_call(
        functools.partial(_fused_forward_kernel, n_layer=L, n_head=n_head),
        out_shape=jax.ShapeDtypeStruct((B, T, O), jnp.float32),
        grid=(B // Bb,),
        in_specs=in_specs,
        out_specs=pl.BlockSpec((Bb, T, O), lambda b: (b, 0, 0)),
        compiler_params=pltpu.CompilerParams(
            dimension_semantics=("parallel",)),
    )(zs, *weights)

    if O == 1:                                   # regression
        return pred[:, ind::freq, 0]             # [B, n]
    return pred[:, ind::freq]                    # classification: [B, n, C]


# ------------------------------ parameter init --------------------------------
def init_params(key, n_dims, n_positions, n_embd=32, n_layer=2, n_head=4,
                pred_type='regression'):
    freq = 2
    block_size = freq * n_positions + 1
    H = 4 * n_embd
    out_dim = 1 if pred_type == 'regression' else MAX_NUM_CLASS
    keys = iter(jax.random.split(key, 32))
    f32, bf16 = jnp.float32, jnp.bfloat16

    def nrm(shape, dtype=f32):
        return (0.02 * jax.random.normal(next(keys), shape)).astype(dtype)

    L = n_layer
    return {
        # MXU-side weights in bf16 (native MXU rate); biases / LN params in f32.
        "w_in": nrm((n_dims, n_embd), bf16),
        "b_in": jnp.zeros((1, n_embd), f32),
        "wpe": nrm((block_size, n_embd), f32),
        "ln1_g": jnp.ones((L, 1, n_embd), f32),
        "ln1_b": jnp.zeros((L, 1, n_embd), f32),
        "w_qkv": nrm((L, 3, n_embd, n_embd), bf16),   # (L,3,E,E): free-axis q/k/v
        "b_qkv": jnp.zeros((L, 3, 1, n_embd), f32),
        "w_o": nrm((L, n_embd, n_embd), bf16),
        "b_o": jnp.zeros((L, 1, n_embd), f32),
        "ln2_g": jnp.ones((L, 1, n_embd), f32),
        "ln2_b": jnp.zeros((L, 1, n_embd), f32),
        "w_fc": nrm((L, n_embd, H), bf16),
        "b_fc": jnp.zeros((L, 1, H), f32),
        "w_pr": nrm((L, H, n_embd), bf16),
        "b_pr": jnp.zeros((L, 1, n_embd), f32),
        "lnf_g": jnp.ones((1, n_embd), f32),
        "lnf_b": jnp.zeros((1, n_embd), f32),
        "w_out": nrm((n_embd, out_dim), bf16),
        "b_out": jnp.zeros((1, out_dim), f32),
    }


# -------------------------- pure-JAX reference (check) -------------------------
def reference_forward(xs, ys, params, n_head, mm_dtype=jnp.float32):
    """Pure-JAX reference.  mm_dtype=bfloat16 emulates the kernel's bf16-operand
    / f32-accumulate matmuls; mm_dtype=float32 gives full-f32 math."""
    freq, ind = 2, 0
    B, n, _ = xs.shape
    T = freq * n
    E = params["ln1_g"].shape[-1]
    hd = E // n_head
    L = params["ln1_g"].shape[0]
    f32 = jnp.float32
    c = lambda a: a.astype(mm_dtype)
    mm = lambda a, b, eq: jnp.einsum(eq, c(a), c(b), preferred_element_type=f32)

    x = (mm(combine(xs, ys), params["w_in"], 'btd,de->bte')
         + params["b_in"] + params["wpe"][:T][None])
    causal = jnp.tril(jnp.ones((T, T), bool))
    for l in range(L):
        xn = _layernorm(x, params["ln1_g"][l], params["ln1_b"][l])
        q = mm(xn, params["w_qkv"][l, 0], 'bte,ef->btf') + params["b_qkv"][l, 0]
        k = mm(xn, params["w_qkv"][l, 1], 'bte,ef->btf') + params["b_qkv"][l, 1]
        v = mm(xn, params["w_qkv"][l, 2], 'bte,ef->btf') + params["b_qkv"][l, 2]
        q = q * (1.0 / math.sqrt(hd))
        q = q.reshape(B, T, n_head, hd).transpose(0, 2, 1, 3)
        k = k.reshape(B, T, n_head, hd).transpose(0, 2, 1, 3)
        v = v.reshape(B, T, n_head, hd).transpose(0, 2, 1, 3)
        att = mm(q, k, 'bhqd,bhkd->bhqk')
        att = jnp.where(causal, att, -1e30)
        p = jax.nn.softmax(att, axis=-1)
        y = mm(p, v, 'bhqk,bhkd->bhqd').transpose(0, 2, 1, 3).reshape(B, T, E)
        x = x + mm(y, params["w_o"][l], 'bte,ef->btf') + params["b_o"][l]
        xn2 = _layernorm(x, params["ln2_g"][l], params["ln2_b"][l])
        h = _gelu(mm(xn2, params["w_fc"][l], 'bte,ef->btf') + params["b_fc"][l])
        x = x + mm(h, params["w_pr"][l], 'bth,he->bte') + params["b_pr"][l]
    xn = _layernorm(x, params["lnf_g"], params["lnf_b"])
    pred = mm(xn, params["w_out"], 'bte,eo->bto') + params["b_out"]
    return pred[:, ind::freq, 0] if pred.shape[-1] == 1 else pred[:, ind::freq]


# ------------------------------------ main -------------------------------------
if __name__ == "__main__":
    B, n, d_in = 2, 8, 4
    n_embd, n_layer, n_head = 32, 2, 4

    key = jax.random.PRNGKey(0)
    kp, kx, ky = jax.random.split(key, 3)
    params = init_params(kp, n_dims=d_in, n_positions=n,
                         n_embd=n_embd, n_layer=n_layer, n_head=n_head)
    xs = jax.random.normal(kx, (B, n, d_in), dtype=jnp.float32)
    ys = jax.random.normal(ky, (B, n), dtype=jnp.float32)

    y = transformer_forward(xs, ys, params, n_head=n_head)
    y = jax.block_until_ready(y)

    assert y.shape == (B, n)
    assert bool(jnp.all(jnp.isfinite(y)))

    # Structural check: reference emulating the kernel's bf16 matmul-operand
    # rounding (same weights, same cast points) -> should agree tightly.
    y_ref_bf16 = reference_forward(xs, ys, params, n_head, mm_dtype=jnp.bfloat16)
    assert float(jnp.max(jnp.abs(y - y_ref_bf16))) < 1e-3
    # Precision sanity check vs full-f32 math on the same (bf16-stored) weights.
    y_ref_f32 = reference_forward(xs, ys, params, n_head, mm_dtype=jnp.float32)
    assert float(jnp.max(jnp.abs(y - y_ref_f32))) < 1e-2

    print("KERNEL_OK")
</pallas_src>

<mosaic_0001>
module attributes {stable_mosaic.version = 11 : i64} {
  func.func @_fused_forward_kernel(%arg0: i32, %arg1: memref<1x16x4xf32, #tpu.memory_space<vmem>>, %arg2: memref<4x32xbf16, #tpu.memory_space<vmem>>, %arg3: memref<1x32xf32, #tpu.memory_space<vmem>>, %arg4: memref<16x32xf32, #tpu.memory_space<vmem>>, %arg5: memref<2x1x32xf32, #tpu.memory_space<vmem>>, %arg6: memref<2x1x32xf32, #tpu.memory_space<vmem>>, %arg7: memref<2x3x32x32xbf16, #tpu.memory_space<vmem>>, %arg8: memref<2x3x1x32xf32, #tpu.memory_space<vmem>>, %arg9: memref<2x32x32xbf16, #tpu.memory_space<vmem>>, %arg10: memref<2x1x32xf32, #tpu.memory_space<vmem>>, %arg11: memref<2x1x32xf32, #tpu.memory_space<vmem>>, %arg12: memref<2x1x32xf32, #tpu.memory_space<vmem>>, %arg13: memref<2x32x128xbf16, #tpu.memory_space<vmem>>, %arg14: memref<2x1x128xf32, #tpu.memory_space<vmem>>, %arg15: memref<2x128x32xbf16, #tpu.memory_space<vmem>>, %arg16: memref<2x1x32xf32, #tpu.memory_space<vmem>>, %arg17: memref<1x32xf32, #tpu.memory_space<vmem>>, %arg18: memref<1x32xf32, #tpu.memory_space<vmem>>, %arg19: memref<32x1xbf16, #tpu.memory_space<vmem>>, %arg20: memref<1x1xf32, #tpu.memory_space<vmem>>, %arg21: memref<1x16x1xf32, #tpu.memory_space<vmem>>) attributes {dimension_semantics = [#tpu.dimension_semantics<parallel>], iteration_bounds = array<i64: 2>, scalar_prefetch = 0 : i64, scratch_operands = 0 : i64, tpu.core_type = #tpu.core_type<tc>, window_params = [{transform_indices = @transform_0, window_bounds = array<i64: 1, 16, 4>}, {pipeline_mode = #tpu.pipeline_mode<synchronous>, transform_indices = @transform_1, window_bounds = array<i64: 4, 32>}, {pipeline_mode = #tpu.pipeline_mode<synchronous>, transform_indices = @transform_2, window_bounds = array<i64: 1, 32>}, {pipeline_mode = #tpu.pipeline_mode<synchronous>, transform_indices = @transform_3, window_bounds = array<i64: 16, 32>}, {pipeline_mode = #tpu.pipeline_mode<synchronous>, transform_indices = @transform_4, window_bounds = array<i64: 2, 1, 32>}, {pipeline_mode = #tpu.pipeline_mode<synchronous>, transform_indices = @transform_5, window_bounds = array<i64: 2, 1, 32>}, {pipeline_mode = #tpu.pipeline_mode<synchronous>, transform_indices = @transform_6, window_bounds = array<i64: 2, 3, 32, 32>}, {pipeline_mode = #tpu.pipeline_mode<synchronous>, transform_indices = @transform_7, window_bounds = array<i64: 2, 3, 1, 32>}, {pipeline_mode = #tpu.pipeline_mode<synchronous>, transform_indices = @transform_8, window_bounds = array<i64: 2, 32, 32>}, {pipeline_mode = #tpu.pipeline_mode<synchronous>, transform_indices = @transform_9, window_bounds = array<i64: 2, 1, 32>}, {pipeline_mode = #tpu.pipeline_mode<synchronous>, transform_indices = @transform_10, window_bounds = array<i64: 2, 1, 32>}, {pipeline_mode = #tpu.pipeline_mode<synchronous>, transform_indices = @transform_11, window_bounds = array<i64: 2, 1, 32>}, {pipeline_mode = #tpu.pipeline_mode<synchronous>, transform_indices = @transform_12, window_bounds = array<i64: 2, 32, 128>}, {pipeline_mode = #tpu.pipeline_mode<synchronous>, transform_indices = @transform_13, window_bounds = array<i64: 2, 1, 128>}, {pipeline_mode = #tpu.pipeline_mode<synchronous>, transform_indices = @transform_14, window_bounds = array<i64: 2, 128, 32>}, {pipeline_mode = #tpu.pipeline_mode<synchronous>, transform_indices = @transform_15, window_bounds = array<i64: 2, 1, 32>}, {pipeline_mode = #tpu.pipeline_mode<synchronous>, transform_indices = @transform_16, window_bounds = array<i64: 1, 32>}, {pipeline_mode = #tpu.pipeline_mode<synchronous>, transform_indices = @transform_17, window_bounds = array<i64: 1, 32>}, {pipeline_mode = #tpu.pipeline_mode<synchronous>, transform_indices = @transform_18, window_bounds = array<i64: 32, 1>}, {pipeline_mode = #tpu.pipeline_mode<synchronous>, transform_indices = @transform_19, window_bounds = array<i64: 1, 1>}, {transform_indices = @transform_20, window_bounds = array<i64: 1, 16, 1>}]} {
    %c0 = arith.constant 0 : index
    %c0_0 = arith.constant 0 : index
    %c0_1 = arith.constant 0 : index
    %0 = vector.load %arg1[%c0, %c0_0, %c0_1] : memref<1x16x4xf32, #tpu.memory_space<vmem>>, vector<1x16x4xf32>
    %1 = vector.shape_cast %0 : vector<1x16x4xf32> to vector<16x4xf32>
    %c0_2 = arith.constant 0 : index
    %c0_3 = arith.constant 0 : index
    %2 = vector.load %arg4[%c0_2, %c0_3] : memref<16x32xf32, #tpu.memory_space<vmem>>, vector<16x32xf32>
    %c0_4 = arith.constant 0 : index
    %c0_5 = arith.constant 0 : index
    %3 = vector.load %arg2[%c0_4, %c0_5] : memref<4x32xbf16, #tpu.memory_space<vmem>>, vector<4x32xbf16>
    %4 = arith.truncf %1 : vector<16x4xf32> to vector<16x4xbf16>
    %cst = arith.constant dense<0.000000e+00> : vector<16x32xf32>
    %5 = tpu.matmul %4, %3, %cst {dimension_numbers = #tpu.dot_dimension_numbers<[1], [0], [0], [1], [0, 0, 1, 1], [], []>} : vector<16x4xbf16>, vector<4x32xbf16>, vector<16x32xf32> -> vector<16x32xf32>
    %c0_6 = arith.constant 0 : index
    %c0_7 = arith.constant 0 : index
    %6 = vector.load %arg3[%c0_6, %c0_7] : memref<1x32xf32, #tpu.memory_space<vmem>>, vector<1x32xf32>
    %7 = vector.broadcast %6 : vector<1x32xf32> to vector<16x32xf32>
    %8 = arith.addf %5, %7 : vector<16x32xf32>
    %9 = arith.addf %8, %2 : vector<16x32xf32>
    %10 = tpu.iota {dimensions = array<i32: 0>} : vector<16x16xi32>
    %11 = tpu.iota {dimensions = array<i32: 1>} : vector<16x16xi32>
    %12 = arith.cmpi sge, %10, %11 : vector<16x16xi32>
    %13 = arith.extui %12 : vector<16x16xi1> to vector<16x16xi32>
    %14 = arith.sitofp %13 : vector<16x16xi32> to vector<16x16xf32>
    %15 = tpu.concatenate %14, %14, %14, %14 in 0 : vector<16x16xf32>, vector<16x16xf32>, vector<16x16xf32>, vector<16x16xf32> -> vector<64x16xf32>
    %16 = tpu.iota {dimensions = array<i32: 1>} : vector<1x32xi32>
    %c0_i32 = arith.constant 0 : i32
    %17 = vector.broadcast %c0_i32 : i32 to vector<1x32xi32>
    %18 = arith.cmpi sge, %16, %17 : vector<1x32xi32>
    %c8_i32 = arith.constant 8 : i32
    %19 = vector.broadcast %c8_i32 : i32 to vector<1x32xi32>
    %20 = arith.cmpi slt, %16, %19 : vector<1x32xi32>
    %21 = arith.andi %18, %20 : vector<1x32xi1>
    %22 = arith.extui %21 : vector<1x32xi1> to vector<1x32xi32>
    %23 = arith.sitofp %22 : vector<1x32xi32> to vector<1x32xf32>
    %c8_i32_8 = arith.constant 8 : i32
    %24 = vector.broadcast %c8_i32_8 : i32 to vector<1x32xi32>
    %25 = arith.cmpi sge, %16, %24 : vector<1x32xi32>
    %c16_i32 = arith.constant 16 : i32
    %26 = vector.broadcast %c16_i32 : i32 to vector<1x32xi32>
    %27 = arith.cmpi slt, %16, %26 : vector<1x32xi32>
    %28 = arith.andi %25, %27 : vector<1x32xi1>
    %29 = arith.extui %28 : vector<1x32xi1> to vector<1x32xi32>
    %30 = arith.sitofp %29 : vector<1x32xi32> to vector<1x32xf32>
    %c16_i32_9 = arith.constant 16 : i32
    %31 = vector.broadcast %c16_i32_9 : i32 to vector<1x32xi32>
    %32 = arith.cmpi sge, %16, %31 : vector<1x32xi32>
    %c24_i32 = arith.constant 24 : i32
    %33 = vector.broadcast %c24_i32 : i32 to vector<1x32xi32>
    %34 = arith.cmpi slt, %16, %33 : vector<1x32xi32>
    %35 = arith.andi %32, %34 : vector<1x32xi1>
    %36 = arith.extui %35 : vector<1x32xi1> to vector<1x32xi32>
    %37 = arith.sitofp %36 : vector<1x32xi32> to vector<1x32xf32>
    %c24_i32_10 = arith.constant 24 : i32
    %38 = vector.broadcast %c24_i32_10 : i32 to vector<1x32xi32>
    %39 = arith.cmpi sge, %16, %38 : vector<1x32xi32>
    %c32_i32 = arith.constant 32 : i32
    %40 = vector.broadcast %c32_i32 : i32 to vector<1x32xi32>
    %41 = arith.cmpi slt, %16, %40 : vector<1x32xi32>
    %42 = arith.andi %39, %41 : vector<1x32xi1>
    %43 = arith.extui %42 : vector<1x32xi1> to vector<1x32xi32>
    %44 = arith.sitofp %43 : vector<1x32xi32> to vector<1x32xf32>
    %cst_11 = arith.constant 0.353553385 : f32
    %45 = vector.broadcast %cst_11 : f32 to vector<1x32xf32>
    %46 = arith.mulf %23, %45 : vector<1x32xf32>
    %cst_12 = arith.constant 0.353553385 : f32
    %47 = vector.broadcast %cst_12 : f32 to vector<1x32xf32>
    %48 = arith.mulf %30, %47 : vector<1x32xf32>
    %cst_13 = arith.constant 0.353553385 : f32
    %49 = vector.broadcast %cst_13 : f32 to vector<1x32xf32>
    %50 = arith.mulf %37, %49 : vector<1x32xf32>
    %cst_14 = arith.constant 0.353553385 : f32
    %51 = vector.broadcast %cst_14 : f32 to vector<1x32xf32>
    %52 = arith.mulf %44, %51 : vector<1x32xf32>
    %c0_15 = arith.constant 0 : index
    %c0_16 = arith.constant 0 : index
    %c0_17 = arith.constant 0 : index
    %53 = vector.load %arg5[%c0_15, %c0_16, %c0_17] : memref<2x1x32xf32, #tpu.memory_space<vmem>>, vector<1x1x32xf32>
    %54 = vector.shape_cast %53 : vector<1x1x32xf32> to vector<1x32xf32>
    %c0_18 = arith.constant 0 : index
    %c0_19 = arith.constant 0 : index
    %c0_20 = arith.constant 0 : index
    %55 = vector.load %arg6[%c0_18, %c0_19, %c0_20] : memref<2x1x32xf32, #tpu.memory_space<vmem>>, vector<1x1x32xf32>
    %56 = vector.shape_cast %55 : vector<1x1x32xf32> to vector<1x32xf32>
    %cst_21 = arith.constant dense<0.000000e+00> : vector<16xf32>
    %57 = vector.multi_reduction <add>, %9, %cst_21 [1] : vector<16x32xf32> to vector<16xf32>
    %58 = vector.shape_cast %57 : vector<16xf32> to vector<16x1xf32>
    %cst_22 = arith.constant 3.200000e+01 : f32
    %59 = vector.broadcast %cst_22 : f32 to vector<16x1xf32>
    %60 = arith.divf %58, %59 : vector<16x1xf32>
    %61 = vector.broadcast %60 : vector<16x1xf32> to vector<16x32xf32>
    %62 = arith.subf %9, %61 : vector<16x32xf32>
    %63 = arith.mulf %62, %62 : vector<16x32xf32>
    %cst_23 = arith.constant dense<0.000000e+00> : vector<16xf32>
    %64 = vector.multi_reduction <add>, %63, %cst_23 [1] : vector<16x32xf32> to vector<16xf32>
    %65 = vector.shape_cast %64 : vector<16xf32> to vector<16x1xf32>
    %cst_24 = arith.constant 3.200000e+01 : f32
    %66 = vector.broadcast %cst_24 : f32 to vector<16x1xf32>
    %67 = arith.divf %65, %66 : vector<16x1xf32>
    %68 = vector.broadcast %60 : vector<16x1xf32> to vector<16x32xf32>
    %69 = arith.subf %9, %68 : vector<16x32xf32>
    %cst_25 = arith.constant 9.99999974E-6 : f32
    %70 = vector.broadcast %cst_25 : f32 to vector<16x1xf32>
    %71 = arith.addf %67, %70 : vector<16x1xf32>
    %72 = math.rsqrt %71 : vector<16x1xf32>
    %73 = vector.broadcast %72 : vector<16x1xf32> to vector<16x32xf32>
    %74 = arith.mulf %69, %73 : vector<16x32xf32>
    %75 = vector.broadcast %54 : vector<1x32xf32> to vector<16x32xf32>
    %76 = arith.mulf %74, %75 : vector<16x32xf32>
    %77 = vector.broadcast %56 : vector<1x32xf32> to vector<16x32xf32>
    %78 = arith.addf %76, %77 : vector<16x32xf32>
    %79 = arith.truncf %78 : vector<16x32xf32> to vector<16x32xbf16>
    %c0_26 = arith.constant 0 : index
    %c0_27 = arith.constant 0 : index
    %c0_28 = arith.constant 0 : index
    %c0_29 = arith.constant 0 : index
    %80 = vector.load %arg7[%c0_26, %c0_27, %c0_28, %c0_29] : memref<2x3x32x32xbf16, #tpu.memory_space<vmem>>, vector<1x1x32x32xbf16>
    %81 = vector.shape_cast %80 : vector<1x1x32x32xbf16> to vector<32x32xbf16>
    %cst_30 = arith.constant dense<0.000000e+00> : vector<16x32xf32>
    %82 = tpu.matmul %79, %81, %cst_30 {dimension_numbers = #tpu.dot_dimension_numbers<[1], [0], [0], [1], [0, 0, 1, 1], [], []>} : vector<16x32xbf16>, vector<32x32xbf16>, vector<16x32xf32> -> vector<16x32xf32>
    %c0_31 = arith.constant 0 : index
    %c0_32 = arith.constant 0 : index
    %c0_33 = arith.constant 0 : index
    %c0_34 = arith.constant 0 : index
    %83 = vector.load %arg8[%c0_31, %c0_32, %c0_33, %c0_34] : memref<2x3x1x32xf32, #tpu.memory_space<vmem>>, vector<1x1x1x32xf32>
    %84 = vector.shape_cast %83 : vector<1x1x1x32xf32> to vector<1x32xf32>
    %85 = vector.broadcast %84 : vector<1x32xf32> to vector<16x32xf32>
    %86 = arith.addf %82, %85 : vector<16x32xf32>
    %c0_35 = arith.constant 0 : index
    %c1 = arith.constant 1 : index
    %c0_36 = arith.constant 0 : index
    %c0_37 = arith.constant 0 : index
    %87 = vector.load %arg7[%c0_35, %c1, %c0_36, %c0_37] : memref<2x3x32x32xbf16, #tpu.memory_space<vmem>>, vector<1x1x32x32xbf16>
    %88 = vector.shape_cast %87 : vector<1x1x32x32xbf16> to vector<32x32xbf16>
    %cst_38 = arith.constant dense<0.000000e+00> : vector<16x32xf32>
    %89 = tpu.matmul %79, %88, %cst_38 {dimension_numbers = #tpu.dot_dimension_numbers<[1], [0], [0], [1], [0, 0, 1, 1], [], []>} : vector<16x32xbf16>, vector<32x32xbf16>, vector<16x32xf32> -> vector<16x32xf32>
    %c0_39 = arith.constant 0 : index
    %c1_40 = arith.constant 1 : index
    %c0_41 = arith.constant 0 : index
    %c0_42 = arith.constant 0 : index
    %90 = vector.load %arg8[%c0_39, %c1_40, %c0_41, %c0_42] : memref<2x3x1x32xf32, #tpu.memory_space<vmem>>, vector<1x1x1x32xf32>
    %91 = vector.shape_cast %90 : vector<1x1x1x32xf32> to vector<1x32xf32>
    %92 = vector.broadcast %91 : vector<1x32xf32> to vector<16x32xf32>
    %93 = arith.addf %89, %92 : vector<16x32xf32>
    %c0_43 = arith.constant 0 : index
    %c2 = arith.constant 2 : index
    %c0_44 = arith.constant 0 : index
    %c0_45 = arith.constant 0 : index
    %94 = vector.load %arg7[%c0_43, %c2, %c0_44, %c0_45] : memref<2x3x32x32xbf16, #tpu.memory_space<vmem>>, vector<1x1x32x32xbf16>
    %95 = vector.shape_cast %94 : vector<1x1x32x32xbf16> to vector<32x32xbf16>
    %cst_46 = arith.constant dense<0.000000e+00> : vector<16x32xf32>
    %96 = tpu.matmul %79, %95, %cst_46 {dimension_numbers = #tpu.dot_dimension_numbers<[1], [0], [0], [1], [0, 0, 1, 1], [], []>} : vector<16x32xbf16>, vector<32x32xbf16>, vector<16x32xf32> -> vector<16x32xf32>
    %c0_47 = arith.constant 0 : index
    %c2_48 = arith.constant 2 : index
    %c0_49 = arith.constant 0 : index
    %c0_50 = arith.constant 0 : index
    %97 = vector.load %arg8[%c0_47, %c2_48, %c0_49, %c0_50] : memref<2x3x1x32xf32, #tpu.memory_space<vmem>>, vector<1x1x1x32xf32>
    %98 = vector.shape_cast %97 : vector<1x1x1x32xf32> to vector<1x32xf32>
    %99 = vector.broadcast %98 : vector<1x32xf32> to vector<16x32xf32>
    %100 = arith.addf %96, %99 : vector<16x32xf32>
    %101 = arith.truncf %93 : vector<16x32xf32> to vector<16x32xbf16>
    %102 = arith.truncf %100 : vector<16x32xf32> to vector<16x32xbf16>
    %103 = vector.broadcast %46 : vector<1x32xf32> to vector<16x32xf32>
    %104 = arith.mulf %86, %103 : vector<16x32xf32>
    %105 = vector.broadcast %48 : vector<1x32xf32> to vector<16x32xf32>
    %106 = arith.mulf %86, %105 : vector<16x32xf32>
    %107 = vector.broadcast %50 : vector<1x32xf32> to vector<16x32xf32>
    %108 = arith.mulf %86, %107 : vector<16x32xf32>
    %109 = vector.broadcast %52 : vector<1x32xf32> to vector<16x32xf32>
    %110 = arith.mulf %86, %109 : vector<16x32xf32>
    %111 = tpu.concatenate %104, %106, %108, %110 in 0 : vector<16x32xf32>, vector<16x32xf32>, vector<16x32xf32>, vector<16x32xf32> -> vector<64x32xf32>
    %112 = arith.truncf %111 : vector<64x32xf32> to vector<64x32xbf16>
    %cst_51 = arith.constant dense<0.000000e+00> : vector<64x16xf32>
    %113 = tpu.matmul %112, %101, %cst_51 {dimension_numbers = #tpu.dot_dimension_numbers<[1], [1], [0], [0], [0, 0, 1, 0], [], []>} : vector<64x32xbf16>, vector<16x32xbf16>, vector<64x16xf32> -> vector<64x16xf32>
    %cst_52 = arith.constant 0.000000e+00 : f32
    %114 = vector.broadcast %cst_52 : f32 to vector<64x16xf32>
    %115 = arith.cmpf ogt, %15, %114 : vector<64x16xf32>
    %cst_53 = arith.constant -1.000000e+30 : f32
    %116 = vector.broadcast %cst_53 : f32 to vector<64x16xf32>
    %117 = arith.select %115, %113, %116 : vector<64x16xi1>, vector<64x16xf32>
    %cst_54 = arith.constant dense<0xFF800000> : vector<64xf32>
    %118 = vector.multi_reduction <maximumf>, %117, %cst_54 [1] : vector<64x16xf32> to vector<64xf32>
    %119 = vector.shape_cast %118 : vector<64xf32> to vector<64x1xf32>
    %120 = vector.broadcast %119 : vector<64x1xf32> to vector<64x16xf32>
    %121 = arith.subf %117, %120 : vector<64x16xf32>
    %122 = math.exp %121 : vector<64x16xf32>
    %cst_55 = arith.constant dense<0.000000e+00> : vector<64xf32>
    %123 = vector.multi_reduction <add>, %122, %cst_55 [1] : vector<64x16xf32> to vector<64xf32>
    %124 = vector.shape_cast %123 : vector<64xf32> to vector<64x1xf32>
    %125 = tpu.reciprocal %124 {approx = true} : vector<64x1xf32> -> vector<64x1xf32>
    %126 = vector.broadcast %125 : vector<64x1xf32> to vector<64x16xf32>
    %127 = arith.mulf %122, %126 : vector<64x16xf32>
    %128 = arith.truncf %127 : vector<64x16xf32> to vector<64x16xbf16>
    %cst_56 = arith.constant dense<0.000000e+00> : vector<64x32xf32>
    %129 = tpu.matmul %128, %102, %cst_56 {dimension_numbers = #tpu.dot_dimension_numbers<[1], [0], [0], [1], [0, 0, 1, 1], [], []>} : vector<64x16xbf16>, vector<16x32xbf16>, vector<64x32xf32> -> vector<64x32xf32>
    %130 = vector.extract_strided_slice %129 {offsets = [0, 0], sizes = [16, 32], strides = [1, 1]} : vector<64x32xf32> to vector<16x32xf32>
    %131 = vector.broadcast %23 : vector<1x32xf32> to vector<16x32xf32>
    %132 = arith.mulf %131, %130 : vector<16x32xf32>
    %133 = vector.extract_strided_slice %129 {offsets = [16, 0], sizes = [16, 32], strides = [1, 1]} : vector<64x32xf32> to vector<16x32xf32>
    %134 = vector.broadcast %30 : vector<1x32xf32> to vector<16x32xf32>
    %135 = arith.mulf %134, %133 : vector<16x32xf32>
    %136 = arith.addf %132, %135 : vector<16x32xf32>
    %137 = vector.extract_strided_slice %129 {offsets = [32, 0], sizes = [16, 32], strides = [1, 1]} : vector<64x32xf32> to vector<16x32xf32>
    %138 = vector.broadcast %37 : vector<1x32xf32> to vector<16x32xf32>
    %139 = arith.mulf %138, %137 : vector<16x32xf32>
    %140 = arith.addf %136, %139 : vector<16x32xf32>
    %141 = vector.extract_strided_slice %129 {offsets = [48, 0], sizes = [16, 32], strides = [1, 1]} : vector<64x32xf32> to vector<16x32xf32>
    %142 = vector.broadcast %44 : vector<1x32xf32> to vector<16x32xf32>
    %143 = arith.mulf %142, %141 : vector<16x32xf32>
    %144 = arith.addf %140, %143 : vector<16x32xf32>
    %c0_57 = arith.constant 0 : index
    %c0_58 = arith.constant 0 : index
    %c0_59 = arith.constant 0 : index
    %145 = vector.load %arg9[%c0_57, %c0_58, %c0_59] : memref<2x32x32xbf16, #tpu.memory_space<vmem>>, vector<1x32x32xbf16>
    %146 = vector.shape_cast %145 : vector<1x32x32xbf16> to vector<32x32xbf16>
    %147 = arith.truncf %144 : vector<16x32xf32> to vector<16x32xbf16>
    %cst_60 = arith.constant dense<0.000000e+00> : vector<16x32xf32>
    %148 = tpu.matmul %147, %146, %cst_60 {dimension_numbers = #tpu.dot_dimension_numbers<[1], [0], [0], [1], [0, 0, 1, 1], [], []>} : vector<16x32xbf16>, vector<32x32xbf16>, vector<16x32xf32> -> vector<16x32xf32>
    %149 = arith.addf %9, %148 : vector<16x32xf32>
    %c0_61 = arith.constant 0 : index
    %c0_62 = arith.constant 0 : index
    %c0_63 = arith.constant 0 : index
    %150 = vector.load %arg10[%c0_61, %c0_62, %c0_63] : memref<2x1x32xf32, #tpu.memory_space<vmem>>, vector<1x1x32xf32>
    %151 = vector.shape_cast %150 : vector<1x1x32xf32> to vector<1x32xf32>
    %152 = vector.broadcast %151 : vector<1x32xf32> to vector<16x32xf32>
    %153 = arith.addf %149, %152 : vector<16x32xf32>
    %c0_64 = arith.constant 0 : index
    %c0_65 = arith.constant 0 : index
    %c0_66 = arith.constant 0 : index
    %154 = vector.load %arg11[%c0_64, %c0_65, %c0_66] : memref<2x1x32xf32, #tpu.memory_space<vmem>>, vector<1x1x32xf32>
    %155 = vector.shape_cast %154 : vector<1x1x32xf32> to vector<1x32xf32>
    %c0_67 = arith.constant 0 : index
    %c0_68 = arith.constant 0 : index
    %c0_69 = arith.constant 0 : index
    %156 = vector.load %arg12[%c0_67, %c0_68, %c0_69] : memref<2x1x32xf32, #tpu.memory_space<vmem>>, vector<1x1x32xf32>
    %157 = vector.shape_cast %156 : vector<1x1x32xf32> to vector<1x32xf32>
    %cst_70 = arith.constant dense<0.000000e+00> : vector<16xf32>
    %158 = vector.multi_reduction <add>, %153, %cst_70 [1] : vector<16x32xf32> to vector<16xf32>
    %159 = vector.shape_cast %158 : vector<16xf32> to vector<16x1xf32>
    %cst_71 = arith.constant 3.200000e+01 : f32
    %160 = vector.broadcast %cst_71 : f32 to vector<16x1xf32>
    %161 = arith.divf %159, %160 : vector<16x1xf32>
    %162 = vector.broadcast %161 : vector<16x1xf32> to vector<16x32xf32>
    %163 = arith.subf %153, %162 : vector<16x32xf32>
    %164 = arith.mulf %163, %163 : vector<16x32xf32>
    %cst_72 = arith.constant dense<0.000000e+00> : vector<16xf32>
    %165 = vector.multi_reduction <add>, %164, %cst_72 [1] : vector<16x32xf32> to vector<16xf32>
    %166 = vector.shape_cast %165 : vector<16xf32> to vector<16x1xf32>
    %cst_73 = arith.constant 3.200000e+01 : f32
    %167 = vector.broadcast %cst_73 : f32 to vector<16x1xf32>
    %168 = arith.divf %166, %167 : vector<16x1xf32>
    %169 = vector.broadcast %161 : vector<16x1xf32> to vector<16x32xf32>
    %170 = arith.subf %153, %169 : vector<16x32xf32>
    %cst_74 = arith.constant 9.99999974E-6 : f32
    %171 = vector.broadcast %cst_74 : f32 to vector<16x1xf32>
    %172 = arith.addf %168, %171 : vector<16x1xf32>
    %173 = math.rsqrt %172 : vector<16x1xf32>
    %174 = vector.broadcast %173 : vector<16x1xf32> to vector<16x32xf32>
    %175 = arith.mulf %170, %174 : vector<16x32xf32>
    %176 = vector.broadcast %155 : vector<1x32xf32> to vector<16x32xf32>
    %177 = arith.mulf %175, %176 : vector<16x32xf32>
    %178 = vector.broadcast %157 : vector<1x32xf32> to vector<16x32xf32>
    %179 = arith.addf %177, %178 : vector<16x32xf32>
    %c0_75 = arith.constant 0 : index
    %c0_76 = arith.constant 0 : index
    %c0_77 = arith.constant 0 : index
    %180 = vector.load %arg13[%c0_75, %c0_76, %c0_77] : memref<2x32x128xbf16, #tpu.memory_space<vmem>>, vector<1x32x128xbf16>
    %181 = vector.shape_cast %180 : vector<1x32x128xbf16> to vector<32x128xbf16>
    %182 = arith.truncf %179 : vector<16x32xf32> to vector<16x32xbf16>
    %cst_78 = arith.constant dense<0.000000e+00> : vector<16x128xf32>
    %183 = tpu.matmul %182, %181, %cst_78 {dimension_numbers = #tpu.dot_dimension_numbers<[1], [0], [0], [1], [0, 0, 1, 1], [], []>} : vector<16x32xbf16>, vector<32x128xbf16>, vector<16x128xf32> -> vector<16x128xf32>
    %c0_79 = arith.constant 0 : index
    %c0_80 = arith.constant 0 : index
    %c0_81 = arith.constant 0 : index
    %184 = vector.load %arg14[%c0_79, %c0_80, %c0_81] : memref<2x1x128xf32, #tpu.memory_space<vmem>>, vector<1x1x128xf32>
    %185 = vector.shape_cast %184 : vector<1x1x128xf32> to vector<1x128xf32>
    %186 = vector.broadcast %185 : vector<1x128xf32> to vector<16x128xf32>
    %187 = arith.addf %183, %186 : vector<16x128xf32>
    %cst_82 = arith.constant 5.000000e-01 : f32
    %188 = vector.broadcast %cst_82 : f32 to vector<16x128xf32>
    %189 = arith.mulf %188, %187 : vector<16x128xf32>
    %cst_83 = arith.constant 4.471500e-02 : f32
    %190 = vector.broadcast %cst_83 : f32 to vector<16x128xf32>
    %191 = arith.mulf %190, %187 : vector<16x128xf32>
    %192 = arith.mulf %191, %187 : vector<16x128xf32>
    %193 = arith.mulf %192, %187 : vector<16x128xf32>
    %194 = arith.addf %187, %193 : vector<16x128xf32>
    %cst_84 = arith.constant 0.797884583 : f32
    %195 = vector.broadcast %cst_84 : f32 to vector<16x128xf32>
    %196 = arith.mulf %195, %194 : vector<16x128xf32>
    %197 = math.tanh %196 : vector<16x128xf32>
    %cst_85 = arith.constant 1.000000e+00 : f32
    %198 = vector.broadcast %cst_85 : f32 to vector<16x128xf32>
    %199 = arith.addf %198, %197 : vector<16x128xf32>
    %200 = arith.mulf %189, %199 : vector<16x128xf32>
    %c0_86 = arith.constant 0 : index
    %c0_87 = arith.constant 0 : index
    %c0_88 = arith.constant 0 : index
    %201 = vector.load %arg15[%c0_86, %c0_87, %c0_88] : memref<2x128x32xbf16, #tpu.memory_space<vmem>>, vector<1x128x32xbf16>
    %202 = vector.shape_cast %201 : vector<1x128x32xbf16> to vector<128x32xbf16>
    %203 = arith.truncf %200 : vector<16x128xf32> to vector<16x128xbf16>
    %cst_89 = arith.constant dense<0.000000e+00> : vector<16x32xf32>
    %204 = tpu.matmul %203, %202, %cst_89 {dimension_numbers = #tpu.dot_dimension_numbers<[1], [0], [0], [1], [0, 0, 1, 1], [], []>} : vector<16x128xbf16>, vector<128x32xbf16>, vector<16x32xf32> -> vector<16x32xf32>
    %205 = arith.addf %153, %204 : vector<16x32xf32>
    %c0_90 = arith.constant 0 : index
    %c0_91 = arith.constant 0 : index
    %c0_92 = arith.constant 0 : index
    %206 = vector.load %arg16[%c0_90, %c0_91, %c0_92] : memref<2x1x32xf32, #tpu.memory_space<vmem>>, vector<1x1x32xf32>
    %207 = vector.shape_cast %206 : vector<1x1x32xf32> to vector<1x32xf32>
    %208 = vector.broadcast %207 : vector<1x32xf32> to vector<16x32xf32>
    %209 = arith.addf %205, %208 : vector<16x32xf32>
    %c1_93 = arith.constant 1 : index
    %c0_94 = arith.constant 0 : index
    %c0_95 = arith.constant 0 : index
    %210 = vector.load %arg5[%c1_93, %c0_94, %c0_95] : memref<2x1x32xf32, #tpu.memory_space<vmem>>, vector<1x1x32xf32>
    %211 = vector.shape_cast %210 : vector<1x1x32xf32> to vector<1x32xf32>
    %c1_96 = arith.constant 1 : index
    %c0_97 = arith.constant 0 : index
    %c0_98 = arith.constant 0 : index
    %212 = vector.load %arg6[%c1_96, %c0_97, %c0_98] : memref<2x1x32xf32, #tpu.memory_space<vmem>>, vector<1x1x32xf32>
    %213 = vector.shape_cast %212 : vector<1x1x32xf32> to vector<1x32xf32>
    %cst_99 = arith.constant dense<0.000000e+00> : vector<16xf32>
    %214 = vector.multi_reduction <add>, %209, %cst_99 [1] : vector<16x32xf32> to vector<16xf32>
    %215 = vector.shape_cast %214 : vector<16xf32> to vector<16x1xf32>
    %cst_100 = arith.constant 3.200000e+01 : f32
    %216 = vector.broadcast %cst_100 : f32 to vector<16x1xf32>
    %217 = arith.divf %215, %216 : vector<16x1xf32>
    %218 = vector.broadcast %217 : vector<16x1xf32> to vector<16x32xf32>
    %219 = arith.subf %209, %218 : vector<16x32xf32>
    %220 = arith.mulf %219, %219 : vector<16x32xf32>
    %cst_101 = arith.constant dense<0.000000e+00> : vector<16xf32>
    %221 = vector.multi_reduction <add>, %220, %cst_101 [1] : vector<16x32xf32> to vector<16xf32>
    %222 = vector.shape_cast %221 : vector<16xf32> to vector<16x1xf32>
    %cst_102 = arith.constant 3.200000e+01 : f32
    %223 = vector.broadcast %cst_102 : f32 to vector<16x1xf32>
    %224 = arith.divf %222, %223 : vector<16x1xf32>
    %225 = vector.broadcast %217 : vector<16x1xf32> to vector<16x32xf32>
    %226 = arith.subf %209, %225 : vector<16x32xf32>
    %cst_103 = arith.constant 9.99999974E-6 : f32
    %227 = vector.broadcast %cst_103 : f32 to vector<16x1xf32>
    %228 = arith.addf %224, %227 : vector<16x1xf32>
    %229 = math.rsqrt %228 : vector<16x1xf32>
    %230 = vector.broadcast %229 : vector<16x1xf32> to vector<16x32xf32>
    %231 = arith.mulf %226, %230 : vector<16x32xf32>
    %232 = vector.broadcast %211 : vector<1x32xf32> to vector<16x32xf32>
    %233 = arith.mulf %231, %232 : vector<16x32xf32>
    %234 = vector.broadcast %213 : vector<1x32xf32> to vector<16x32xf32>
    %235 = arith.addf %233, %234 : vector<16x32xf32>
    %236 = arith.truncf %235 : vector<16x32xf32> to vector<16x32xbf16>
    %c1_104 = arith.constant 1 : index
    %c0_105 = arith.constant 0 : index
    %c0_106 = arith.constant 0 : index
    %c0_107 = arith.constant 0 : index
    %237 = vector.load %arg7[%c1_104, %c0_105, %c0_106, %c0_107] : memref<2x3x32x32xbf16, #tpu.memory_space<vmem>>, vector<1x1x32x32xbf16>
    %238 = vector.shape_cast %237 : vector<1x1x32x32xbf16> to vector<32x32xbf16>
    %cst_108 = arith.constant dense<0.000000e+00> : vector<16x32xf32>
    %239 = tpu.matmul %236, %238, %cst_108 {dimension_numbers = #tpu.dot_dimension_numbers<[1], [0], [0], [1], [0, 0, 1, 1], [], []>} : vector<16x32xbf16>, vector<32x32xbf16>, vector<16x32xf32> -> vector<16x32xf32>
    %c1_109 = arith.constant 1 : index
    %c0_110 = arith.constant 0 : index
    %c0_111 = arith.constant 0 : index
    %c0_112 = arith.constant 0 : index
    %240 = vector.load %arg8[%c1_109, %c0_110, %c0_111, %c0_112] : memref<2x3x1x32xf32, #tpu.memory_space<vmem>>, vector<1x1x1x32xf32>
    %241 = vector.shape_cast %240 : vector<1x1x1x32xf32> to vector<1x32xf32>
    %242 = vector.broadcast %241 : vector<1x32xf32> to vector<16x32xf32>
    %243 = arith.addf %239, %242 : vector<16x32xf32>
    %c1_113 = arith.constant 1 : index
    %c1_114 = arith.constant 1 : index
    %c0_115 = arith.constant 0 : index
    %c0_116 = arith.constant 0 : index
    %244 = vector.load %arg7[%c1_113, %c1_114, %c0_115, %c0_116] : memref<2x3x32x32xbf16, #tpu.memory_space<vmem>>, vector<1x1x32x32xbf16>
    %245 = vector.shape_cast %244 : vector<1x1x32x32xbf16> to vector<32x32xbf16>
    %cst_117 = arith.constant dense<0.000000e+00> : vector<16x32xf32>
    %246 = tpu.matmul %236, %245, %cst_117 {dimension_numbers = #tpu.dot_dimension_numbers<[1], [0], [0], [1], [0, 0, 1, 1], [], []>} : vector<16x32xbf16>, vector<32x32xbf16>, vector<16x32xf32> -> vector<16x32xf32>
    %c1_118 = arith.constant 1 : index
    %c1_119 = arith.constant 1 : index
    %c0_120 = arith.constant 0 : index
    %c0_121 = arith.constant 0 : index
    %247 = vector.load %arg8[%c1_118, %c1_119, %c0_120, %c0_121] : memref<2x3x1x32xf32, #tpu.memory_space<vmem>>, vector<1x1x1x32xf32>
    %248 = vector.shape_cast %247 : vector<1x1x1x32xf32> to vector<1x32xf32>
    %249 = vector.broadcast %248 : vector<1x32xf32> to vector<16x32xf32>
    %250 = arith.addf %246, %249 : vector<16x32xf32>
    %c1_122 = arith.constant 1 : index
    %c2_123 = arith.constant 2 : index
    %c0_124 = arith.constant 0 : index
    %c0_125 = arith.constant 0 : index
    %251 = vector.load %arg7[%c1_122, %c2_123, %c0_124, %c0_125] : memref<2x3x32x32xbf16, #tpu.memory_space<vmem>>, vector<1x1x32x32xbf16>
    %252 = vector.shape_cast %251 : vector<1x1x32x32xbf16> to vector<32x32xbf16>
    %cst_126 = arith.constant dense<0.000000e+00> : vector<16x32xf32>
    %253 = tpu.matmul %236, %252, %cst_126 {dimension_numbers = #tpu.dot_dimension_numbers<[1], [0], [0], [1], [0, 0, 1, 1], [], []>} : vector<16x32xbf16>, vector<32x32xbf16>, vector<16x32xf32> -> vector<16x32xf32>
    %c1_127 = arith.constant 1 : index
    %c2_128 = arith.constant 2 : index
    %c0_129 = arith.constant 0 : index
    %c0_130 = arith.constant 0 : index
    %254 = vector.load %arg8[%c1_127, %c2_128, %c0_129, %c0_130] : memref<2x3x1x32xf32, #tpu.memory_space<vmem>>, vector<1x1x1x32xf32>
    %255 = vector.shape_cast %254 : vector<1x1x1x32xf32> to vector<1x32xf32>
    %256 = vector.broadcast %255 : vector<1x32xf32> to vector<16x32xf32>
    %257 = arith.addf %253, %256 : vector<16x32xf32>
    %258 = arith.truncf %250 : vector<16x32xf32> to vector<16x32xbf16>
    %259 = arith.truncf %257 : vector<16x32xf32> to vector<16x32xbf16>
    %260 = vector.broadcast %46 : vector<1x32xf32> to vector<16x32xf32>
    %261 = arith.mulf %243, %260 : vector<16x32xf32>
    %262 = vector.broadcast %48 : vector<1x32xf32> to vector<16x32xf32>
    %263 = arith.mulf %243, %262 : vector<16x32xf32>
    %264 = vector.broadcast %50 : vector<1x32xf32> to vector<16x32xf32>
    %265 = arith.mulf %243, %264 : vector<16x32xf32>
    %266 = vector.broadcast %52 : vector<1x32xf32> to vector<16x32xf32>
    %267 = arith.mulf %243, %266 : vector<16x32xf32>
    %268 = tpu.concatenate %261, %263, %265, %267 in 0 : vector<16x32xf32>, vector<16x32xf32>, vector<16x32xf32>, vector<16x32xf32> -> vector<64x32xf32>
    %269 = arith.truncf %268 : vector<64x32xf32> to vector<64x32xbf16>
    %cst_131 = arith.constant dense<0.000000e+00> : vector<64x16xf32>
    %270 = tpu.matmul %269, %258, %cst_131 {dimension_numbers = #tpu.dot_dimension_numbers<[1], [1], [0], [0], [0, 0, 1, 0], [], []>} : vector<64x32xbf16>, vector<16x32xbf16>, vector<64x16xf32> -> vector<64x16xf32>
    %cst_132 = arith.constant 0.000000e+00 : f32
    %271 = vector.broadcast %cst_132 : f32 to vector<64x16xf32>
    %272 = arith.cmpf ogt, %15, %271 : vector<64x16xf32>
    %cst_133 = arith.constant -1.000000e+30 : f32
    %273 = vector.broadcast %cst_133 : f32 to vector<64x16xf32>
    %274 = arith.select %272, %270, %273 : vector<64x16xi1>, vector<64x16xf32>
    %cst_134 = arith.constant dense<0xFF800000> : vector<64xf32>
    %275 = vector.multi_reduction <maximumf>, %274, %cst_134 [1] : vector<64x16xf32> to vector<64xf32>
    %276 = vector.shape_cast %275 : vector<64xf32> to vector<64x1xf32>
    %277 = vector.broadcast %276 : vector<64x1xf32> to vector<64x16xf32>
    %278 = arith.subf %274, %277 : vector<64x16xf32>
    %279 = math.exp %278 : vector<64x16xf32>
    %cst_135 = arith.constant dense<0.000000e+00> : vector<64xf32>
    %280 = vector.multi_reduction <add>, %279, %cst_135 [1] : vector<64x16xf32> to vector<64xf32>
    %281 = vector.shape_cast %280 : vector<64xf32> to vector<64x1xf32>
    %282 = tpu.reciprocal %281 {approx = true} : vector<64x1xf32> -> vector<64x1xf32>
    %283 = vector.broadcast %282 : vector<64x1xf32> to vector<64x16xf32>
    %284 = arith.mulf %279, %283 : vector<64x16xf32>
    %285 = arith.truncf %284 : vector<64x16xf32> to vector<64x16xbf16>
    %cst_136 = arith.constant dense<0.000000e+00> : vector<64x32xf32>
    %286 = tpu.matmul %285, %259, %cst_136 {dimension_numbers = #tpu.dot_dimension_numbers<[1], [0], [0], [1], [0, 0, 1, 1], [], []>} : vector<64x16xbf16>, vector<16x32xbf16>, vector<64x32xf32> -> vector<64x32xf32>
    %287 = vector.extract_strided_slice %286 {offsets = [0, 0], sizes = [16, 32], strides = [1, 1]} : vector<64x32xf32> to vector<16x32xf32>
    %288 = vector.broadcast %23 : vector<1x32xf32> to vector<16x32xf32>
    %289 = arith.mulf %288, %287 : vector<16x32xf32>
    %290 = vector.extract_strided_slice %286 {offsets = [16, 0], sizes = [16, 32], strides = [1, 1]} : vector<64x32xf32> to vector<16x32xf32>
    %291 = vector.broadcast %30 : vector<1x32xf32> to vector<16x32xf32>
    %292 = arith.mulf %291, %290 : vector<16x32xf32>
    %293 = arith.addf %289, %292 : vector<16x32xf32>
    %294 = vector.extract_strided_slice %286 {offsets = [32, 0], sizes = [16, 32], strides = [1, 1]} : vector<64x32xf32> to vector<16x32xf32>
    %295 = vector.broadcast %37 : vector<1x32xf32> to vector<16x32xf32>
    %296 = arith.mulf %295, %294 : vector<16x32xf32>
    %297 = arith.addf %293, %296 : vector<16x32xf32>
    %298 = vector.extract_strided_slice %286 {offsets = [48, 0], sizes = [16, 32], strides = [1, 1]} : vector<64x32xf32> to vector<16x32xf32>
    %299 = vector.broadcast %44 : vector<1x32xf32> to vector<16x32xf32>
    %300 = arith.mulf %299, %298 : vector<16x32xf32>
    %301 = arith.addf %297, %300 : vector<16x32xf32>
    %c1_137 = arith.constant 1 : index
    %c0_138 = arith.constant 0 : index
    %c0_139 = arith.constant 0 : index
    %302 = vector.load %arg9[%c1_137, %c0_138, %c0_139] : memref<2x32x32xbf16, #tpu.memory_space<vmem>>, vector<1x32x32xbf16>
    %303 = vector.shape_cast %302 : vector<1x32x32xbf16> to vector<32x32xbf16>
    %304 = arith.truncf %301 : vector<16x32xf32> to vector<16x32xbf16>
    %cst_140 = arith.constant dense<0.000000e+00> : vector<16x32xf32>
    %305 = tpu.matmul %304, %303, %cst_140 {dimension_numbers = #tpu.dot_dimension_numbers<[1], [0], [0], [1], [0, 0, 1, 1], [], []>} : vector<16x32xbf16>, vector<32x32xbf16>, vector<16x32xf32> -> vector<16x32xf32>
    %306 = arith.addf %209, %305 : vector<16x32xf32>
    %c1_141 = arith.constant 1 : index
    %c0_142 = arith.constant 0 : index
    %c0_143 = arith.constant 0 : index
    %307 = vector.load %arg10[%c1_141, %c0_142, %c0_143] : memref<2x1x32xf32, #tpu.memory_space<vmem>>, vector<1x1x32xf32>
    %308 = vector.shape_cast %307 : vector<1x1x32xf32> to vector<1x32xf32>
    %309 = vector.broadcast %308 : vector<1x32xf32> to vector<16x32xf32>
    %310 = arith.addf %306, %309 : vector<16x32xf32>
    %c1_144 = arith.constant 1 : index
    %c0_145 = arith.constant 0 : index
    %c0_146 = arith.constant 0 : index
    %311 = vector.load %arg11[%c1_144, %c0_145, %c0_146] : memref<2x1x32xf32, #tpu.memory_space<vmem>>, vector<1x1x32xf32>
    %312 = vector.shape_cast %311 : vector<1x1x32xf32> to vector<1x32xf32>
    %c1_147 = arith.constant 1 : index
    %c0_148 = arith.constant 0 : index
    %c0_149 = arith.constant 0 : index
    %313 = vector.load %arg12[%c1_147, %c0_148, %c0_149] : memref<2x1x32xf32, #tpu.memory_space<vmem>>, vector<1x1x32xf32>
    %314 = vector.shape_cast %313 : vector<1x1x32xf32> to vector<1x32xf32>
    %cst_150 = arith.constant dense<0.000000e+00> : vector<16xf32>
    %315 = vector.multi_reduction <add>, %310, %cst_150 [1] : vector<16x32xf32> to vector<16xf32>
    %316 = vector.shape_cast %315 : vector<16xf32> to vector<16x1xf32>
    %cst_151 = arith.constant 3.200000e+01 : f32
    %317 = vector.broadcast %cst_151 : f32 to vector<16x1xf32>
    %318 = arith.divf %316, %317 : vector<16x1xf32>
    %319 = vector.broadcast %318 : vector<16x1xf32> to vector<16x32xf32>
    %320 = arith.subf %310, %319 : vector<16x32xf32>
    %321 = arith.mulf %320, %320 : vector<16x32xf32>
    %cst_152 = arith.constant dense<0.000000e+00> : vector<16xf32>
    %322 = vector.multi_reduction <add>, %321, %cst_152 [1] : vector<16x32xf32> to vector<16xf32>
    %323 = vector.shape_cast %322 : vector<16xf32> to vector<16x1xf32>
    %cst_153 = arith.constant 3.200000e+01 : f32
    %324 = vector.broadcast %cst_153 : f32 to vector<16x1xf32>
    %325 = arith.divf %323, %324 : vector<16x1xf32>
    %326 = vector.broadcast %318 : vector<16x1xf32> to vector<16x32xf32>
    %327 = arith.subf %310, %326 : vector<16x32xf32>
    %cst_154 = arith.constant 9.99999974E-6 : f32
    %328 = vector.broadcast %cst_154 : f32 to vector<16x1xf32>
    %329 = arith.addf %325, %328 : vector<16x1xf32>
    %330 = math.rsqrt %329 : vector<16x1xf32>
    %331 = vector.broadcast %330 : vector<16x1xf32> to vector<16x32xf32>
    %332 = arith.mulf %327, %331 : vector<16x32xf32>
    %333 = vector.broadcast %312 : vector<1x32xf32> to vector<16x32xf32>
    %334 = arith.mulf %332, %333 : vector<16x32xf32>
    %335 = vector.broadcast %314 : vector<1x32xf32> to vector<16x32xf32>
    %336 = arith.addf %334, %335 : vector<16x32xf32>
    %c1_155 = arith.constant 1 : index
    %c0_156 = arith.constant 0 : index
    %c0_157 = arith.constant 0 : index
    %337 = vector.load %arg13[%c1_155, %c0_156, %c0_157] : memref<2x32x128xbf16, #tpu.memory_space<vmem>>, vector<1x32x128xbf16>
    %338 = vector.shape_cast %337 : vector<1x32x128xbf16> to vector<32x128xbf16>
    %339 = arith.truncf %336 : vector<16x32xf32> to vector<16x32xbf16>
    %cst_158 = arith.constant dense<0.000000e+00> : vector<16x128xf32>
    %340 = tpu.matmul %339, %338, %cst_158 {dimension_numbers = #tpu.dot_dimension_numbers<[1], [0], [0], [1], [0, 0, 1, 1], [], []>} : vector<16x32xbf16>, vector<32x128xbf16>, vector<16x128xf32> -> vector<16x128xf32>
    %c1_159 = arith.constant 1 : index
    %c0_160 = arith.constant 0 : index
    %c0_161 = arith.constant 0 : index
    %341 = vector.load %arg14[%c1_159, %c0_160, %c0_161] : memref<2x1x128xf32, #tpu.memory_space<vmem>>, vector<1x1x128xf32>
    %342 = vector.shape_cast %341 : vector<1x1x128xf32> to vector<1x128xf32>
    %343 = vector.broadcast %342 : vector<1x128xf32> to vector<16x128xf32>
    %344 = arith.addf %340, %343 : vector<16x128xf32>
    %cst_162 = arith.constant 5.000000e-01 : f32
    %345 = vector.broadcast %cst_162 : f32 to vector<16x128xf32>
    %346 = arith.mulf %345, %344 : vector<16x128xf32>
    %cst_163 = arith.constant 4.471500e-02 : f32
    %347 = vector.broadcast %cst_163 : f32 to vector<16x128xf32>
    %348 = arith.mulf %347, %344 : vector<16x128xf32>
    %349 = arith.mulf %348, %344 : vector<16x128xf32>
    %350 = arith.mulf %349, %344 : vector<16x128xf32>
    %351 = arith.addf %344, %350 : vector<16x128xf32>
    %cst_164 = arith.constant 0.797884583 : f32
    %352 = vector.broadcast %cst_164 : f32 to vector<16x128xf32>
    %353 = arith.mulf %352, %351 : vector<16x128xf32>
    %354 = math.tanh %353 : vector<16x128xf32>
    %cst_165 = arith.constant 1.000000e+00 : f32
    %355 = vector.broadcast %cst_165 : f32 to vector<16x128xf32>
    %356 = arith.addf %355, %354 : vector<16x128xf32>
    %357 = arith.mulf %346, %356 : vector<16x128xf32>
    %c1_166 = arith.constant 1 : index
    %c0_167 = arith.constant 0 : index
    %c0_168 = arith.constant 0 : index
    %358 = vector.load %arg15[%c1_166, %c0_167, %c0_168] : memref<2x128x32xbf16, #tpu.memory_space<vmem>>, vector<1x128x32xbf16>
    %359 = vector.shape_cast %358 : vector<1x128x32xbf16> to vector<128x32xbf16>
    %360 = arith.truncf %357 : vector<16x128xf32> to vector<16x128xbf16>
    %cst_169 = arith.constant dense<0.000000e+00> : vector<16x32xf32>
    %361 = tpu.matmul %360, %359, %cst_169 {dimension_numbers = #tpu.dot_dimension_numbers<[1], [0], [0], [1], [0, 0, 1, 1], [], []>} : vector<16x128xbf16>, vector<128x32xbf16>, vector<16x32xf32> -> vector<16x32xf32>
    %362 = arith.addf %310, %361 : vector<16x32xf32>
    %c1_170 = arith.constant 1 : index
    %c0_171 = arith.constant 0 : index
    %c0_172 = arith.constant 0 : index
    %363 = vector.load %arg16[%c1_170, %c0_171, %c0_172] : memref<2x1x32xf32, #tpu.memory_space<vmem>>, vector<1x1x32xf32>
    %364 = vector.shape_cast %363 : vector<1x1x32xf32> to vector<1x32xf32>
    %365 = vector.broadcast %364 : vector<1x32xf32> to vector<16x32xf32>
    %366 = arith.addf %362, %365 : vector<16x32xf32>
    %c0_173 = arith.constant 0 : index
    %c0_174 = arith.constant 0 : index
    %367 = vector.load %arg17[%c0_173, %c0_174] : memref<1x32xf32, #tpu.memory_space<vmem>>, vector<1x32xf32>
    %c0_175 = arith.constant 0 : index
    %c0_176 = arith.constant 0 : index
    %368 = vector.load %arg18[%c0_175, %c0_176] : memref<1x32xf32, #tpu.memory_space<vmem>>, vector<1x32xf32>
    %cst_177 = arith.constant dense<0.000000e+00> : vector<16xf32>
    %369 = vector.multi_reduction <add>, %366, %cst_177 [1] : vector<16x32xf32> to vector<16xf32>
    %370 = vector.shape_cast %369 : vector<16xf32> to vector<16x1xf32>
    %cst_178 = arith.constant 3.200000e+01 : f32
    %371 = vector.broadcast %cst_178 : f32 to vector<16x1xf32>
    %372 = arith.divf %370, %371 : vector<16x1xf32>
    %373 = vector.broadcast %372 : vector<16x1xf32> to vector<16x32xf32>
    %374 = arith.subf %366, %373 : vector<16x32xf32>
    %375 = arith.mulf %374, %374 : vector<16x32xf32>
    %cst_179 = arith.constant dense<0.000000e+00> : vector<16xf32>
    %376 = vector.multi_reduction <add>, %375, %cst_179 [1] : vector<16x32xf32> to vector<16xf32>
    %377 = vector.shape_cast %376 : vector<16xf32> to vector<16x1xf32>
    %cst_180 = arith.constant 3.200000e+01 : f32
    %378 = vector.broadcast %cst_180 : f32 to vector<16x1xf32>
    %379 = arith.divf %377, %378 : vector<16x1xf32>
    %380 = vector.broadcast %372 : vector<16x1xf32> to vector<16x32xf32>
    %381 = arith.subf %366, %380 : vector<16x32xf32>
    %cst_181 = arith.constant 9.99999974E-6 : f32
    %382 = vector.broadcast %cst_181 : f32 to vector<16x1xf32>
    %383 = arith.addf %379, %382 : vector<16x1xf32>
    %384 = math.rsqrt %383 : vector<16x1xf32>
    %385 = vector.broadcast %384 : vector<16x1xf32> to vector<16x32xf32>
    %386 = arith.mulf %381, %385 : vector<16x32xf32>
    %387 = vector.broadcast %367 : vector<1x32xf32> to vector<16x32xf32>
    %388 = arith.mulf %386, %387 : vector<16x32xf32>
    %389 = vector.broadcast %368 : vector<1x32xf32> to vector<16x32xf32>
    %390 = arith.addf %388, %389 : vector<16x32xf32>
    %c0_182 = arith.constant 0 : index
    %c0_183 = arith.constant 0 : index
    %391 = vector.load %arg19[%c0_182, %c0_183] : memref<32x1xbf16, #tpu.memory_space<vmem>>, vector<32x1xbf16>
    %392 = arith.truncf %390 : vector<16x32xf32> to vector<16x32xbf16>
    %cst_184 = arith.constant dense<0.000000e+00> : vector<16x1xf32>
    %393 = tpu.matmul %392, %391, %cst_184 {dimension_numbers = #tpu.dot_dimension_numbers<[1], [0], [0], [1], [0, 0, 1, 1], [], []>} : vector<16x32xbf16>, vector<32x1xbf16>, vector<16x1xf32> -> vector<16x1xf32>
    %c0_185 = arith.constant 0 : index
    %c0_186 = arith.constant 0 : index
    %394 = vector.load %arg20[%c0_185, %c0_186] : memref<1x1xf32, #tpu.memory_space<vmem>>, vector<1x1xf32>
    %395 = vector.broadcast %394 : vector<1x1xf32> to vector<16x1xf32>
    %396 = arith.addf %393, %395 : vector<16x1xf32>
    %397 = vector.shape_cast %396 : vector<16x1xf32> to vector<1x16x1xf32>
    %c0_187 = arith.constant 0 : index
    %c0_188 = arith.constant 0 : index
    %c0_189 = arith.constant 0 : index
    %398 = vector.load %arg21[%c0_187, %c0_188, %c0_189] : memref<1x16x1xf32, #tpu.memory_space<vmem>>, vector<1x16x1xf32>
    tpu.vector_store %arg21[%c0_187, %c0_188, %c0_189], %397 {strides = array<i32>} : memref<1x16x1xf32, #tpu.memory_space<vmem>>, vector<1x16x1xf32>,
    return
  }
  func.func @transform_0(%arg0: i32) -> (i32, i32, i32) {
    %c0_i32 = arith.constant 0 : i32
    %c0_i32_0 = arith.constant 0 : i32
    %c0_i32_1 = arith.constant 0 : i32
    return %arg0, %c0_i32, %c0_i32_0 : i32, i32, i32
  }
  func.func @transform_1(%arg0: i32) -> (i32, i32) {
    %c0_i32 = arith.constant 0 : i32
    %c0_i32_0 = arith.constant 0 : i32
    %c0_i32_1 = arith.constant 0 : i32
    return %c0_i32, %c0_i32_0 : i32, i32
  }
  func.func @transform_2(%arg0: i32) -> (i32, i32) {
    %c0_i32 = arith.constant 0 : i32
    %c0_i32_0 = arith.constant 0 : i32
    %c0_i32_1 = arith.constant 0 : i32
    return %c0_i32, %c0_i32_0 : i32, i32
  }
  func.func @transform_3(%arg0: i32) -> (i32, i32) {
    %c0_i32 = arith.constant 0 : i32
    %c0_i32_0 = arith.constant 0 : i32
    %c0_i32_1 = arith.constant 0 : i32
    return %c0_i32, %c0_i32_0 : i32, i32
  }
  func.func @transform_4(%arg0: i32) -> (i32, i32, i32) {
    %c0_i32 = arith.constant 0 : i32
    %c0_i32_0 = arith.constant 0 : i32
    %c0_i32_1 = arith.constant 0 : i32
    %c0_i32_2 = arith.constant 0 : i32
    return %c0_i32, %c0_i32_0, %c0_i32_1 : i32, i32, i32
  }
  func.func @transform_5(%arg0: i32) -> (i32, i32, i32) {
    %c0_i32 = arith.constant 0 : i32
    %c0_i32_0 = arith.constant 0 : i32
    %c0_i32_1 = arith.constant 0 : i32
    %c0_i32_2 = arith.constant 0 : i32
    return %c0_i32, %c0_i32_0, %c0_i32_1 : i32, i32, i32
  }
  func.func @transform_6(%arg0: i32) -> (i32, i32, i32, i32) {
    %c0_i32 = arith.constant 0 : i32
    %c0_i32_0 = arith.constant 0 : i32
    %c0_i32_1 = arith.constant 0 : i32
    %c0_i32_2 = arith.constant 0 : i32
    %c0_i32_3 = arith.constant 0 : i32
    return %c0_i32, %c0_i32_0, %c0_i32_1, %c0_i32_2 : i32, i32, i32, i32
  }
  func.func @transform_7(%arg0: i32) -> (i32, i32, i32, i32) {
    %c0_i32 = arith.constant 0 : i32
    %c0_i32_0 = arith.constant 0 : i32
    %c0_i32_1 = arith.constant 0 : i32
    %c0_i32_2 = arith.constant 0 : i32
    %c0_i32_3 = arith.constant 0 : i32
    return %c0_i32, %c0_i32_0, %c0_i32_1, %c0_i32_2 : i32, i32, i32, i32
  }
  func.func @transform_8(%arg0: i32) -> (i32, i32, i32) {
    %c0_i32 = arith.constant 0 : i32
    %c0_i32_0 = arith.constant 0 : i32
    %c0_i32_1 = arith.constant 0 : i32
    %c0_i32_2 = arith.constant 0 : i32
    return %c0_i32, %c0_i32_0, %c0_i32_1 : i32, i32, i32
  }
  func.func @transform_9(%arg0: i32) -> (i32, i32, i32) {
    %c0_i32 = arith.constant 0 : i32
    %c0_i32_0 = arith.constant 0 : i32
    %c0_i32_1 = arith.constant 0 : i32
    %c0_i32_2 = arith.constant 0 : i32
    return %c0_i32, %c0_i32_0, %c0_i32_1 : i32, i32, i32
  }
  func.func @transform_10(%arg0: i32) -> (i32, i32, i32) {
    %c0_i32 = arith.constant 0 : i32
    %c0_i32_0 = arith.constant 0 : i32
    %c0_i32_1 = arith.constant 0 : i32
    %c0_i32_2 = arith.constant 0 : i32
    return %c0_i32, %c0_i32_0, %c0_i32_1 : i32, i32, i32
  }
  func.func @transform_11(%arg0: i32) -> (i32, i32, i32) {
    %c0_i32 = arith.constant 0 : i32
    %c0_i32_0 = arith.constant 0 : i32
    %c0_i32_1 = arith.constant 0 : i32
    %c0_i32_2 = arith.constant 0 : i32
    return %c0_i32, %c0_i32_0, %c0_i32_1 : i32, i32, i32
  }
  func.func @transform_12(%arg0: i32) -> (i32, i32, i32) {
    %c0_i32 = arith.constant 0 : i32
    %c0_i32_0 = arith.constant 0 : i32
    %c0_i32_1 = arith.constant 0 : i32
    %c0_i32_2 = arith.constant 0 : i32
    return %c0_i32, %c0_i32_0, %c0_i32_1 : i32, i32, i32
  }
  func.func @transform_13(%arg0: i32) -> (i32, i32, i32) {
    %c0_i32 = arith.constant 0 : i32
    %c0_i32_0 = arith.constant 0 : i32
    %c0_i32_1 = arith.constant 0 : i32
    %c0_i32_2 = arith.constant 0 : i32
    return %c0_i32, %c0_i32_0, %c0_i32_1 : i32, i32, i32
  }
  func.func @transform_14(%arg0: i32) -> (i32, i32, i32) {
    %c0_i32 = arith.constant 0 : i32
    %c0_i32_0 = arith.constant 0 : i32
    %c0_i32_1 = arith.constant 0 : i32
    %c0_i32_2 = arith.constant 0 : i32
    return %c0_i32, %c0_i32_0, %c0_i32_1 : i32, i32, i32
  }
  func.func @transform_15(%arg0: i32) -> (i32, i32, i32) {
    %c0_i32 = arith.constant 0 : i32
    %c0_i32_0 = arith.constant 0 : i32
    %c0_i32_1 = arith.constant 0 : i32
    %c0_i32_2 = arith.constant 0 : i32
    return %c0_i32, %c0_i32_0, %c0_i32_1 : i32, i32, i32
  }
  func.func @transform_16(%arg0: i32) -> (i32, i32) {
    %c0_i32 = arith.constant 0 : i32
    %c0_i32_0 = arith.constant 0 : i32
    %c0_i32_1 = arith.constant 0 : i32
    return %c0_i32, %c0_i32_0 : i32, i32
  }
  func.func @transform_17(%arg0: i32) -> (i32, i32) {
    %c0_i32 = arith.constant 0 : i32
    %c0_i32_0 = arith.constant 0 : i32
    %c0_i32_1 = arith.constant 0 : i32
    return %c0_i32, %c0_i32_0 : i32, i32
  }
  func.func @transform_18(%arg0: i32) -> (i32, i32) {
    %c0_i32 = arith.constant 0 : i32
    %c0_i32_0 = arith.constant 0 : i32
    %c0_i32_1 = arith.constant 0 : i32
    return %c0_i32, %c0_i32_0 : i32, i32
  }
  func.func @transform_19(%arg0: i32) -> (i32, i32) {
    %c0_i32 = arith.constant 0 : i32
    %c0_i32_0 = arith.constant 0 : i32
    %c0_i32_1 = arith.constant 0 : i32
    return %c0_i32, %c0_i32_0 : i32, i32
  }
  func.func @transform_20(%arg0: i32) -> (i32, i32, i32) {
    %c0_i32 = arith.constant 0 : i32
    %c0_i32_0 = arith.constant 0 : i32
    %c0_i32_1 = arith.constant 0 : i32
    return %arg0, %c0_i32, %c0_i32_0 : i32, i32, i32
  }
}

</mosaic_0001>

<bundles_post_ra>
// kernel: transformer_forward.1
= control target key start
LH: loop header
LB: loop body
LE: loop exit
PB: predicated region body
PF: predicated region fallthrough
CT: control target
= control target key end

     0   :  { %s3287_s23 = smov 0   ;;  %s3802_s0 = inlined_call_operand.vmem [shape: f32[2,16,4], index: 0, kind: input, shape index: {}]   ;;  %s3803_s1 = inlined_call_operand.vmem [shape: bf16[4,32], index: 1, kind: input, shape index: {}]   ;;  %s3804_s2 = inlined_call_operand.vmem [shape: f32[1,32], index: 2, kind: input, shape index: {}]   ;;  %s3805_s3 = inlined_call_operand.vmem [shape: f32[16,32], index: 3, kind: input, shape index: {}]   ;;  %s3806_s4 = inlined_call_operand.vmem [shape: f32[2,1,32], index: 4, kind: input, shape index: {}]   ;;  %s3807_s5 = inlined_call_operand.vmem [shape: f32[2,1,32], index: 5, kind: input, shape index: {}]   ;;  %s3808_s6 = inlined_call_operand.vmem [shape: bf16[2,3,32,32], index: 6, kind: input, shape index: {}]   ;;  %s3809_s7 = inlined_call_operand.vmem [shape: f32[2,3,1,32], index: 7, kind: input, shape index: {}]   ;;  %s3810_s8 = inlined_call_operand.vmem [shape: bf16[2,32,32], index: 8, kind: input, shape index: {}]   ;;  %s3811_s9 = inlined_call_operand.vmem [shape: f32[2,1,32], index: 9, kind: input, shape index: {}]   ;;  %s3812_s10 = inlined_call_operand.vmem [shape: f32[2,1,32], index: 10, kind: input, shape index: {}]   ;;  %s3813_s11 = inlined_call_operand.vmem [shape: f32[2,1,32], index: 11, kind: input, shape index: {}]   ;;  %s3814_s12 = inlined_call_operand.vmem [shape: bf16[2,32,128], index: 12, kind: input, shape index: {}]   ;;  %s3815_s13 = inlined_call_operand.vmem [shape: f32[2,1,128], index: 13, kind: input, shape index: {}]   ;;  %s3816_s14 = inlined_call_operand.vmem [shape: bf16[2,128,32], index: 14, kind: input, shape index: {}]   ;;  %s3817_s15 = inlined_call_operand.vmem [shape: f32[2,1,32], index: 15, kind: input, shape index: {}]   ;;  %s3818_s16 = inlined_call_operand.vmem [shape: f32[1,32], index: 16, kind: input, shape index: {}]   ;;  %s3819_s17 = inlined_call_operand.vmem [shape: f32[1,32], index: 17, kind: input, shape index: {}]   ;;  %s3820_s18 = inlined_call_operand.vmem [shape: bf16[32,1], index: 18, kind: input, shape index: {}]   ;;  %s3821_s19 = inlined_call_operand.<no memory space> [shape: f32[1,1], index: 19, kind: input, shape index: {}]   ;;  %s3822_s20 = inlined_call_operand.vmem [shape: f32[2,16,1], index: 20, kind: output, shape index: {}]  }
   0x1   :  { %3825 = sst [smem:[#allocation3_spill]] %s3802_s0  ;;  %v25_v0 = vstv %s3821_s19 }
   0x2   :  { %3826 = sst [smem:[#allocation4_spill]] %s3803_s1  ;;  %26 = vst [vmem:[#allocation2] sm:$0x1] %v25_v0 }
   0x3   :  { %3827 = sst [smem:[#allocation5_spill]] %s3804_s2 }
   0x4   :  { %3828 = sst [smem:[#allocation6_spill]] %s3805_s3 }
   0x5   :  { %3829 = sst [smem:[#allocation7_spill]] %s3806_s4 }
   0x6 LB: > { %s2615_s24 = sadd.s32 4294967295, %s3175_s23   ;;  %p2619_p0 = scmp.ge.s32.totalorder %s3175_s23, 1  ;;  %s3175_s23 = sphi %s3287_s23, %s32_s23  }
   0x7   : > { %p564_p1 = scmp.lt.s32.totalorder %s3175_s23, 3 }
   0x9   : > { %p565_p2 = pnand %p2619_p0, %p564_p1 }
   0xa   : > { %s3830_s3 = sld [smem:[#allocation4_spill]] (!%p565_p2)  ;;  %p622_p3 = scmp.lt.s32.totalorder (!%p565_p2), %s2615_s24, 1 }
   0xb   : > { %568 = sbr.rel (%p565_p2) target bundleno = 5129 (0x1409), region = 100  ;;  %s3831_s28 = sld [smem:[#allocation3_spill]] (!%p565_p2) }
   0xc   : > { %s3832_s0 = sld [smem:[#allocation5_spill]] (!%p565_p2) }
   0xd   : > { %s3833_s22 = sld [smem:[#allocation6_spill]] (!%p565_p2) }
   0xe   : > { %s3834_s2 = sld [smem:[#allocation7_spill]] (!%p565_p2) }
  0x10   : > { %v637_v1 = vld [vmem:[%s3830_s3] sm:$0x3]  ;;  %vm650_vm0 = vcmask 1041408   ;;  %v3177_v2 = vmov 0.0   ;;  %vm3178_vm1 = vmmov 0   ;;  %s3836_s24 = smov (!%p622_p3, %s2615_s24), 1  ;;  %v697_v53 = vlaneseq }
  0x11   : > { %2853 = vmatprep.subr.bf16.mxu0 %v3177_v2  ;;  %v652_v3 = vsel %vm650_vm0, %v637_v1, 0  ;;  %2855 = vmatprep.mubr.msk.bf16.mxu0 %vm3178_vm1, %v3177_v2  ;;  %s2778_s19 = sshll.u32 %s3836_s24, 4  ;;  %vm646_vm2 = vcmask 31744   ;;  %vm734_vm3 = vcmask 261120   ;;  %v3039_v30 = vld [vmem:[%s3808_s6 + $0x8] sm:$0xff]   ;;  %v3040_v31 = vld [vmem:[%s3808_s6 + $0x18] sm:$0xff]  }
  0x12   : > { %2854 = vmatpush3.bf16.msra.mxu0 %v652_v3  ;;  %2859 = vmatprep.subr.bf16.mxu1 %v3177_v2  ;;  %s626_s4 = scalar_lea.vmem %s3831_s28, %s2778_s19  ;;  %v2624_v7 = vld [vmem:[%s3832_s0] ss:$0 sm:$0xff]  ;;  %v3042_v33 = vld [vmem:[%s3808_s6 + $0x10] sm:$0xff]   ;;  %v3043_v50 = vld [vmem:[%s3808_s6 + $0x28] sm:$0xff]   ;;  %v3370_v54 = vand.u32 127, %v697_v53  ;;  %s631_s26 = scalar_lea.vmem %s3822_s20, %s2778_s19 }
  0x13   : > { %2867 = vmatprep.subr.bf16.mxu0 %v3177_v2  ;;  %2863 = vmatprep.mubr.msk.bf16.mxu1 %vm3178_vm1, %v3177_v2  ;;  %v633_v4 = vld [vmem:[%s626_s4] sm:$0xff]  ;;  %v634_v5 = vld [vmem:[%s626_s4 + $0x8] sm:$0xff] }
  0x14   : > { %v638_v6 = vpack.c.bf16 %v634_v5, %v633_v4  ;;  %v635_v8 = vld [vmem:[%s3833_s22] sm:$0xff]  ;;  %v636_v13 = vld [vmem:[%s3833_s22 + $0x8] sm:$0xff]  ;;  %2860 = vmatpush3.bf16.msra.mxu1 %v3039_v30  ;;  %vm709_vm4 = vcmp.lt.s32.totalorder %v3370_v54, 8  ;;  %vm713_vm5 = vcmp.ge.s32.totalorder %v3370_v54, 8  ;;  %vm714_vm6 = vcmp.lt.s32.totalorder %v3370_v54, 16 }
  0x15   : > { %v3041_v32 = vld [vmem:[%s3808_s6] sm:$0xff]   ;;  %2861 = vmatprep.subr.bf16.mxu1 %v3177_v2  ;;  %v3374_v55 = vsel %vm709_vm4, 1.0, %v3177_v2  ;;  %vm718_vm7 = vcmp.ge.s32.totalorder %v3370_v54, 16  ;;  %vm719_vm8 = vcmp.lt.s32.totalorder %v3370_v54, 24  ;;  %vm715_vm9 = vmand %vm713_vm5, %vm714_vm6  ;;  %vm723_vm11 = vcmp.ge.s32.totalorder %v3370_v54, 24 }
  0x16   : > { %2856 = vmatmul.mubr.msk.bf16.vlgmr.msra.gmra.mxu0 %vm646_vm2, %v638_v6  ;;  %v2632_v42 = vld [vmem:[%s3834_s2] ss:$0 sm:$0xff]  ;;  %v3384_v61 = vmul.f32 0.35355338, %v3374_v55  ;;  %v2643_v63 = vld [vmem:[%s3809_s7 + $0x1] ss:$0 sm:$0xff]  ;;  %vm720_vm10 = vmand %vm718_vm7, %vm719_vm8 }
  0x17   : > { %2871 = vmatprep.mubr.msk.bf16.mxu0 %vm3178_vm1, %v3177_v2  ;;  %2868 = vmatpush3.bf16.msra.mxu0 %v3040_v31  ;;  %v2633_v46 = vld [vmem:[%s3807_s5] ss:$0 sm:$0xff]  ;;  %vm724_vm12 = vcmp.lt.s32.totalorder %v3370_v54, 32  ;;  %vm1082_vm2 = vcmask 130048  }
  0x18   : > { %2869 = vmatprep.subr.bf16.mxu0 %v3177_v2  ;;  %2862 = vmatpush3.bf16.msra.mxu1 %v3041_v32  ;;  %v3044_v52 = vld [vmem:[%s3808_s6 + $0x20] sm:$0xff]   ;;  %vm725_vm13 = vmand %vm723_vm11, %vm724_vm12 }
  0x19   : > { %2875 = vmatprep.subr.bf16.mxu1 %v3177_v2  ;;  %v2634_v56 = vld [vmem:[%s3809_s7] ss:$0 sm:$0xff] }
  0x1b   : > { %2870 = vmatpush3.bf16.msra.mxu0 %v3042_v33 }
  0xd6   : > { %v688_v9 = vpop.f32.mrf.mxu0 }
  0xd7   : > { %v689_v10 = vadd.f32 %v2624_v7, %v688_v9 }
  0xd8   : > { %v2857_v11 = vpop.f32.mrf.mxu0 }
  0xd9   : > { %v3321_v12 = vadd.f32 %v689_v10, %v635_v8  ;;  %v3390_v8 = vsel %vm715_vm9, 1.0, %v3177_v2  ;;  %v3395_v11 = vsel %vm720_vm10, 1.0, %v3177_v2 }
  0xda   : > { %v691_v14 = vpop.f32.mrf.mxu0 }
  0xdb   : > { %v692_v15 = vadd.f32 %v2624_v7, %v691_v14  ;;  %v735_v16 = vsel %vm734_vm3, %v3321_v12, 0.0 }
  0xdc   : > { %736 = vadd.xlane.f32.xlu0 %v735_v16  ;;  %v2858_v17 = vpop.f32.mrf.mxu0  ;;  %v3400_v16 = vmul.f32 0.35355338, %v3390_v8 }
  0xdd   : > { %v3328_v18 = vadd.f32 %v692_v15, %v636_v13  ;;  %v2652_v17 = vld [vmem:[%s3809_s7 + $0x2] ss:$0 sm:$0xff] }
  0xdf   : > { %v738_v19 = vsel %vm734_vm3, %v3328_v18, 0.0 }
  0xe0   : > { %739 = vadd.xlane.f32.xlu0 %v738_v19 }
 0x165   : > { %v737_v20 = vpop.xlane.xlu0 %736 }
 0x166   : > { %v742_v21 = vmul.f32 0.03125, %v737_v20 }
 0x168   : > { %v744_v22 = vsub.f32 %v3321_v12, %v742_v21  ;;  %v3408_v21 = vmul.f32 0.35355338, %v3395_v11 }
 0x169   : > { %v740_v23 = vpop.xlane.xlu0 %739 }
 0x16a   : > { %v743_v24 = vmul.f32 0.03125, %v740_v23  ;;  %v746_v25 = vmul.f32 %v744_v22, %v744_v22 }
 0x16c   : > { %v745_v26 = vsub.f32 %v3328_v18, %v743_v24  ;;  %v748_v27 = vsel %vm734_vm3, %v746_v25, 0.0 }
 0x16d   : > { %749 = vadd.xlane.f32.xlu1 %v748_v27 }
 0x16e   : > { %v747_v28 = vmul.f32 %v745_v26, %v745_v26 }
 0x170   : > { %v751_v29 = vsel %vm734_vm3, %v747_v28, 0.0 }
 0x171   : > { %752 = vadd.xlane.f32.xlu1 %v751_v29  ;;  %v3416_v29 = vsel %vm725_vm13, 1.0, %v3177_v2 }
 0x1f6   : > { %v750_v34 = vpop.xlane.xlu1 %749 }
 0x1f7   : > { %v754_v35 = vmul.f32 0.03125, %v750_v34  ;;  %v3420_v34 = vmul.f32 0.35355338, %v3416_v29 }
 0x1f9   : > { %v756_v36 = vadd.f32 1e-05, %v754_v35 }
 0x1fa   : > { %v753_v37 = vpop.xlane.xlu1 %752 }
 0x1fb   : > { %3077 = vrsqrt.f32 %v756_v36  ;;  %v755_v38 = vmul.f32 0.03125, %v753_v37 }
 0x1fd   : > { %v757_v39 = vadd.f32 1e-05, %v755_v38  ;;  %v698_v38 = vshrl.u32 %v697_v53, 7 }
 0x1ff   : > { %3079 = vrsqrt.f32 %v757_v39  ;;  %vm702_vm14 = vcmp.ge.s32.totalorder %v698_v38, %v3370_v54  ;;  %v699_v39 = vadd.s32 8, %v698_v38 }
 0x201   : > { %vm703_vm15 = vcmp.ge.s32.totalorder %v699_v39, %v3370_v54 }
 0x208   : > { %v3078_v40 = vpop.eup %3077 }
 0x209   : > { %v760_v41 = vmul.f32 %v3078_v40, %v744_v22  ;;  %v3433_v40 = vsel %vm702_vm14, 1.0, %v3177_v2 }
 0x20a   : > { %vm1072_vm0 = vcmp.gt.f32.partialorder %v3433_v40, 0.0 }
 0x20b   : > { %v768_v45 = vmul.f32 %v2632_v42, %v760_v41 }
 0x20c   : > { %v3080_v43 = vpop.eup %3079 }
 0x20d   : > { %v761_v44 = vmul.f32 %v3080_v43, %v745_v26  ;;  %v776_v48 = vadd.f32 %v2633_v46, %v768_v45 }
 0x20f   : > { %v769_v47 = vmul.f32 %v2632_v42, %v761_v44  ;;  %v3440_v44 = vsel %vm703_vm15, 1.0, %v3177_v2 }
 0x210   : > { %vm1073_vm4 = vcmp.gt.f32.partialorder %v3440_v44, 0.0 }
 0x211   : > { %v777_v49 = vadd.f32 %v2633_v46, %v769_v47 }
 0x213   : > { %v778_v51 = vpack.c.bf16 %v777_v49, %v776_v48 }
 0x215   : > { %2864 = vmatmul.mubr.msk.bf16.vlgmr.msra.gmra.mxu1 %vm734_vm3, %v778_v51  ;;  %2872 = vmatmul.mubr.msk.bf16.vlgmr.msra.gmra.mxu0 %vm734_vm3, %v778_v51 }
 0x216   : > { %2876 = vmatpush3.bf16.msra.mxu1 %v3043_v50  ;;  %2879 = vmatprep.mubr.msk.bf16.mxu1 %vm3178_vm1, %v3177_v2 }
 0x217   : > { %2877 = vmatprep.subr.bf16.mxu1 %v3177_v2 }
 0x21a   : > { %2878 = vmatpush3.bf16.msra.mxu1 %v3044_v52 }
 0x21d   : > { %2880 = vmatmul.mubr.msk.bf16.vlgmr.msra.gmra.mxu1 %vm734_vm3, %v778_v51 }
 0x2d5   : > { %v839_v57 = vpop.f32.mrf.mxu1  ;;  %v905_v58 = vpop.f32.mrf.mxu0 }
 0x2d6   : > { %v840_v62 = vadd.f32 %v2634_v56, %v839_v57  ;;  %v906_v5 = vadd.f32 %v2643_v63, %v905_v58 }
 0x2d7   : > { %v2865_v59 = vpop.f32.mrf.mxu1  ;;  %v2873_v60 = vpop.f32.mrf.mxu0 }
 0x2d8   : > { %v980_v9 = vmul.f32 %v840_v62, %v3384_v61  ;;  %v982_v27 = vmul.f32 %v840_v62, %v3400_v16  ;;  %v984_v30 = vmul.f32 %v840_v62, %v3408_v21  ;;  %v986_v36 = vmul.f32 %v840_v62, %v3420_v34 }
 0x2d9   : > { %v842_v0 = vpop.f32.mrf.mxu1  ;;  %v908_v1 = vpop.f32.mrf.mxu0 }
 0x2da   : > { %v843_v3 = vadd.f32 %v2634_v56, %v842_v0  ;;  %v909_v4 = vadd.f32 %v2643_v63, %v908_v1 }
 0x2db   : > { %v2866_v6 = vpop.f32.mrf.mxu1  ;;  %v2874_v7 = vpop.f32.mrf.mxu0 }
 0x2dc   : > { %v981_v10 = vmul.f32 %v843_v3, %v3384_v61  ;;  %v978_v13 = vpack.c.bf16 %v909_v4, %v906_v5  ;;  %v983_v22 = vmul.f32 %v843_v3, %v3400_v16  ;;  %v985_v24 = vmul.f32 %v843_v3, %v3408_v21 }
 0x2dd   : > { %v971_v14 = vpop.f32.mrf.mxu1  ;;  %v987_v35 = vmul.f32 %v843_v3, %v3420_v34 }
 0x2de   : > { %v988_v15 = vpack.c.bf16 %v981_v10, %v980_v9  ;;  %3027 = vmatprep.subr.msk.bf16.mxu0 %vm734_vm3, %v978_v13  ;;  %v1005_v20 = vsel %vm734_vm3, %v978_v13, 0  ;;  %v972_v25 = vadd.f32 %v2652_v17, %v971_v14  ;;  %v989_v32 = vpack.c.bf16 %v983_v22, %v982_v27 }
 0x2df   : > { %v2881_v19 = vpop.f32.mrf.mxu1  ;;  %2884 = vmatpush3.bf16.xpose.msra.mxu0 %v1005_v20  ;;  %v990_v33 = vpack.c.bf16 %v985_v24, %v984_v30  ;;  %v991_v37 = vpack.c.bf16 %v987_v35, %v986_v36 }
 0x2e0   : > { %2885 = vmatprep.mubr.msk.bf16.mxu0 %vm734_vm3, %v988_v15  ;;  %2903 = vmatprep.subr.bf16.mxu0 %v3177_v2 }
 0x2e1   : > { %v974_v23 = vpop.f32.mrf.mxu1 }
 0x2e2   : > { %v975_v26 = vadd.f32 %v2652_v17, %v974_v23 }
 0x2e3   : > { %v2882_v28 = vpop.f32.mrf.mxu1 }
 0x2e4   : > { %v979_v31 = vpack.c.bf16 %v975_v26, %v972_v25 }
 0x2e6   : > { %2893 = vmatprep.subr.bf16.mxu1 %v979_v31  ;;  %2886 = vmatmul.mubr.msk.bf16.vlgmr.msra.gmra.mxu0 %vm734_vm3, %v989_v32 }
 0x2e7   : > { %2894 = vmatpush3.bf16.msra.mxu1 %v979_v31  ;;  %2889 = vmatprep.mubr.msk.bf16.mxu0 %vm734_vm3, %v990_v33 }
 0x2e8   : > { %2911 = vmatprep.subr.bf16.mxu1 %v3177_v2 }
 0x2ee   : > { %2890 = vmatmul.mubr.msk.bf16.gmra.mxu0 %vm734_vm3, %v991_v37 }
 0x2ef   : > { %2907 = vmatprep.mubr.msk.bf16.mxu0 %vm3178_vm1, %v3177_v2 }
 0x3a6   : > { %v2887_v41 = vpop.f32.mrf.mxu0 }
 0x3a7   : > { %v1076_v47 = vsel %vm1072_vm0, %v2887_v41, -1e+30 }
 0x3a8   : > { %v1041_v42 = vpop.f32.mrf.mxu0  ;;  %v1089_v51 = vsel %vm1082_vm2, %v1076_v47, -inf }
 0x3a9   : > { %v1074_v43 = vsel %vm1072_vm0, %v1041_v42, -1e+30 }
 0x3aa   : > { %v2888_v45 = vpop.f32.mrf.mxu0  ;;  %v1083_v46 = vsel %vm1082_vm2, %v1074_v43, -inf }
 0x3ab   : > { %1084 = vmax.xlane.f32.xlu0 %v1083_v46  ;;  %v1077_v53 = vsel %vm1073_vm4, %v2888_v45, -1e+30 }
 0x3ac   : > { %v1044_v48 = vpop.f32.mrf.mxu0  ;;  %v1092_v58 = vsel %vm1082_vm2, %v1077_v53, -inf }
 0x3ad   : > { %v1075_v49 = vsel %vm1073_vm4, %v1044_v48, -1e+30 }
 0x3ae   : > { %v2891_v50 = vpop.f32.mrf.mxu0  ;;  %v1086_v52 = vsel %vm1082_vm2, %v1075_v49, -inf }
 0x3af   : > { %1090 = vmax.xlane.f32.xlu0 %v1089_v51  ;;  %1087 = vmax.xlane.f32.xlu1 %v1086_v52  ;;  %v1080_v60 = vsel %vm1072_vm0, %v2891_v50, -1e+30 }
 0x3b0   : > { %v1057_v54 = vpop.f32.mrf.mxu0  ;;  %v1101_v0 = vsel %vm1082_vm2, %v1080_v60, -inf }
 0x3b1   : > { %v1078_v56 = vsel %vm1072_vm0, %v1057_v54, -1e+30 }
 0x3b2   : > { %v2892_v57 = vpop.f32.mrf.mxu0  ;;  %v1095_v59 = vsel %vm1082_vm2, %v1078_v56, -inf }
 0x3b3   : > { %1093 = vmax.xlane.f32.xlu1 %v1092_v58  ;;  %1096 = vmax.xlane.f32.xlu0 %v1095_v59  ;;  %v1081_v3 = vsel %vm1073_vm4, %v2892_v57, -1e+30 }
 0x3b4   : > { %v1060_v62 = vpop.f32.mrf.mxu0  ;;  %v1104_v4 = vsel %vm1082_vm2, %v1081_v3, -inf }
 0x3b5   : > { %v1079_v63 = vsel %vm1073_vm4, %v1060_v62, -1e+30 }
 0x3b6   : > { %v1098_v1 = vsel %vm1082_vm2, %v1079_v63, -inf }
 0x3b7   : > { %1102 = vmax.xlane.f32.xlu0 %v1101_v0  ;;  %1099 = vmax.xlane.f32.xlu1 %v1098_v1 }
 0x3bb   : > { %1105 = vmax.xlane.f32.xlu1 %v1104_v4 }
 0x434   : > { %v1085_v5 = vpop.xlane.xlu0 %1084 }
 0x435   : > { %v1107_v6 = vsub.f32 %v1074_v43, %v1085_v5 }
 0x437   : > { %v1115_v7 = vmul.f32 1.442695, %v1107_v6 }
 0x438   : > { %v1091_v9 = vpop.xlane.xlu0 %1090  ;;  %v1088_v10 = vpop.xlane.xlu1 %1087 }
 0x439   : > { %3081 = vpow2.f32 %v1115_v7  ;;  %v1109_v13 = vsub.f32 %v1076_v47, %v1091_v9  ;;  %v1108_v14 = vsub.f32 %v1075_v49, %v1088_v10 }
 0x43b   : > { %v1119_v15 = vmul.f32 1.442695, %v1109_v13  ;;  %v1117_v17 = vmul.f32 1.442695, %v1108_v14 }
 0x43c   : > { %v1094_v19 = vpop.xlane.xlu1 %1093  ;;  %v1097_v20 = vpop.xlane.xlu0 %1096 }
 0x43d   : > { %3083 = vpow2.f32 %v1119_v15  ;;  %v1110_v22 = vsub.f32 %v1077_v53, %v1094_v19  ;;  %v1111_v23 = vsub.f32 %v1078_v56, %v1097_v20 }
 0x43e   : > { %3085 = vpow2.f32 %v1117_v17 }
 0x43f   : > { %v1121_v24 = vmul.f32 1.442695, %v1110_v22  ;;  %v1123_v25 = vmul.f32 1.442695, %v1111_v23 }
 0x440   : > { %v1103_v26 = vpop.xlane.xlu0 %1102  ;;  %v1100_v27 = vpop.xlane.xlu1 %1099 }
 0x441   : > { %3087 = vpow2.f32 %v1121_v24  ;;  %v1113_v28 = vsub.f32 %v1080_v60, %v1103_v26  ;;  %v1112_v30 = vsub.f32 %v1079_v63, %v1100_v27 }
 0x442   : > { %3089 = vpow2.f32 %v1123_v25 }
 0x443   : > { %v1127_v31 = vmul.f32 1.442695, %v1113_v28  ;;  %v1125_v32 = vmul.f32 1.442695, %v1112_v30  ;;  %v3045_v28 = vld [vmem:[%s3810_s8 + $0x8] sm:$0xff]   ;;  %v3046_v30 = vld [vmem:[%s3810_s8] sm:$0xff]  }
 0x444   : > { %v1106_v33 = vpop.xlane.xlu1 %1105  ;;  %2904 = vmatpush3.bf16.msra.mxu0 %v3045_v28 }
 0x445   : > { %3091 = vpow2.f32 %v1127_v31  ;;  %v1114_v35 = vsub.f32 %v1081_v3, %v1106_v33  ;;  %2905 = vmatprep.subr.bf16.mxu0 %v3177_v2 }
 0x446   : > { %v3082_v36 = vpop.eup %3081  ;;  %3093 = vpow2.f32 %v1125_v32 }
 0x447   : > { %v1129_v37 = vmul.f32 1.442695, %v1114_v35  ;;  %v1131_v38 = vsel %vm1082_vm2, %v3082_v36, 0.0 }
 0x448   : > { %1132 = vadd.xlane.f32.xlu0 %v1131_v38  ;;  %2906 = vmatpush3.bf16.msra.mxu0 %v3046_v30 }
 0x449   : > { %3095 = vpow2.f32 %v1129_v37  ;;  %2919 = vmatprep.subr.bf16.mxu0 %v3177_v2 }
 0x44a   : > { %v3084_v39 = vpop.eup %3083 }
 0x44b   : > { %v3086_v41 = vpop.eup %3085  ;;  %v1137_v42 = vsel %vm1082_vm2, %v3084_v39, 0.0 }
 0x44c   : > { %1138 = vadd.xlane.f32.xlu0 %v1137_v42  ;;  %v1134_v43 = vsel %vm1082_vm2, %v3086_v41, 0.0 }
 0x44d   : > { %1135 = vadd.xlane.f32.xlu1 %v1134_v43 }
 0x44e   : > { %v3088_v45 = vpop.eup %3087 }
 0x44f   : > { %v3090_v46 = vpop.eup %3089  ;;  %v1140_v47 = vsel %vm1082_vm2, %v3088_v45, 0.0 }
 0x450   : > { %v1143_v48 = vsel %vm1082_vm2, %v3090_v46, 0.0 }
 0x451   : > { %1144 = vadd.xlane.f32.xlu0 %v1143_v48  ;;  %1141 = vadd.xlane.f32.xlu1 %v1140_v47 }
 0x452   : > { %v3092_v49 = vpop.eup %3091 }
 0x453   : > { %v3094_v50 = vpop.eup %3093  ;;  %v1149_v51 = vsel %vm1082_vm2, %v3092_v49, 0.0 }
 0x454   : > { %v1146_v52 = vsel %vm1082_vm2, %v3094_v50, 0.0 }
 0x455   : > { %1150 = vadd.xlane.f32.xlu0 %v1149_v51  ;;  %1147 = vadd.xlane.f32.xlu1 %v1146_v52 }
 0x456   : > { %v3096_v53 = vpop.eup %3095 }
 0x457   : > { %v1152_v54 = vsel %vm1082_vm2, %v3096_v53, 0.0 }
 0x459   : > { %1153 = vadd.xlane.f32.xlu1 %v1152_v54 }
 0x4d1   : > { %v1133_v56 = vpop.xlane.xlu0 %1132 }
 0x4d2   : > { %3097 = vrcp.f32 %v1133_v56 }
 0x4d5   : > { %v1139_v57 = vpop.xlane.xlu0 %1138 }
 0x4d6   : > { %v1136_v58 = vpop.xlane.xlu1 %1135 }
 0x4d7   : > { %3099 = vrcp.f32 %v1136_v58 }
 0x4d8   : > { %3101 = vrcp.f32 %v1139_v57 }
 0x4da   : > { %v1145_v59 = vpop.xlane.xlu0 %1144  ;;  %v1142_v60 = vpop.xlane.xlu1 %1141 }
 0x4db   : > { %3103 = vrcp.f32 %v1142_v60 }
 0x4dc   : > { %3105 = vrcp.f32 %v1145_v59  ;;  %v2667_v59 = vld [vmem:[%s3811_s9] ss:$0 sm:$0xff] }
 0x4de   : > { %v1151_v62 = vpop.xlane.xlu0 %1150  ;;  %v1148_v63 = vpop.xlane.xlu1 %1147 }
 0x4df   : > { %3107 = vrcp.f32 %v1148_v63  ;;  %v3098_v0 = vpop.eup %3097 }
 0x4e0   : > { %3109 = vrcp.f32 %v1151_v62  ;;  %v1163_v4 = vmul.f32 %v3098_v0, %v3082_v36 }
 0x4e2   : > { %v1154_v1 = vpop.xlane.xlu1 %1153 }
 0x4e3   : > { %3111 = vrcp.f32 %v1154_v1 }
 0x4e4   : > { %v3100_v3 = vpop.eup %3099 }
 0x4e5   : > { %v1164_v5 = vmul.f32 %v3100_v3, %v3086_v41  ;;  %v3102_v6 = vpop.eup %3101 }
 0x4e6   : > { %v1165_v10 = vmul.f32 %v3102_v6, %v3084_v39 }
 0x4e7   : > { %v1171_v7 = vpack.c.bf16 %v1164_v5, %v1163_v4 }
 0x4e8   : > { %v3104_v9 = vpop.eup %3103 }
 0x4e9   : > { %2895 = vmatprep.mubr.msk.bf16.mxu1 %vm1082_vm2, %v1171_v7  ;;  %v1166_v13 = vmul.f32 %v3104_v9, %v3088_v45  ;;  %v3106_v14 = vpop.eup %3105 }
 0x4ea   : > { %v1167_v20 = vmul.f32 %v3106_v14, %v3090_v46 }
 0x4eb   : > { %v1172_v15 = vpack.c.bf16 %v1166_v13, %v1165_v10 }
 0x4ec   : > { %v3108_v17 = vpop.eup %3107 }
 0x4ed   : > { %v3110_v19 = vpop.eup %3109  ;;  %2896 = vmatmul.mubr.msk.bf16.vlgmr.msra.gmra.mxu1 %vm1082_vm2, %v1172_v15  ;;  %v1168_v22 = vmul.f32 %v3108_v17, %v3094_v50 }
 0x4ee   : > { %v1169_v25 = vmul.f32 %v3110_v19, %v3092_v49 }
 0x4ef   : > { %v1173_v24 = vpack.c.bf16 %v1168_v22, %v1167_v20  ;;  %v3047_v20 = vld [vmem:[%s3814_s12 + $0x8] sm:$0xff]   ;;  %v3048_v22 = vld [vmem:[%s3814_s12] sm:$0xff]  }
 0x4f0   : > { %v3112_v23 = vpop.eup %3111  ;;  %2912 = vmatpush3.bf16.msra.mxu1 %v3047_v20 }
 0x4f1   : > { %v1170_v26 = vmul.f32 %v3112_v23, %v3096_v53  ;;  %2899 = vmatprep.mubr.msk.bf16.mxu1 %vm1082_vm2, %v1173_v24  ;;  %2913 = vmatprep.subr.bf16.mxu1 %v3177_v2 }
 0x4f3   : > { %v1174_v27 = vpack.c.bf16 %v1170_v26, %v1169_v25 }
 0x4f4   : > { %2914 = vmatpush3.bf16.msra.mxu1 %v3048_v22 }
 0x4f5   : > { %2900 = vmatmul.mubr.msk.bf16.gmra.mxu1 %vm1082_vm2, %v1174_v27  ;;  %2939 = vmatprep.subr.bf16.mxu1 %v3177_v2 }
 0x4f6   : > { %2915 = vmatprep.mubr.msk.bf16.mxu1 %vm3178_vm1, %v3177_v2 }
 0x5ad   : > { %v2897_v31 = vpop.f32.mrf.mxu1 }
 0x5ae   : > { %v1254_v39 = vmul.f32 %v2897_v31, %v3390_v8 }
 0x5af   : > { %v1221_v32 = vpop.f32.mrf.mxu1 }
 0x5b0   : > { %v1252_v37 = vmul.f32 %v3374_v55, %v1221_v32  ;;  %v2668_v32 = vld [vmem:[%s3812_s10] ss:$0 sm:$0xff] }
 0x5b1   : > { %v2898_v33 = vpop.f32.mrf.mxu1 }
 0x5b2   : > { %v1256_v45 = vadd.f32 %v1254_v39, %v1252_v37  ;;  %v1255_v46 = vmul.f32 %v2898_v33, %v3390_v8  ;;  %v2669_v37 = vld [vmem:[%s3813_s11] ss:$0 sm:$0xff] }
 0x5b3   : > { %v1224_v35 = vpop.f32.mrf.mxu1 }
 0x5b4   : > { %v1253_v41 = vmul.f32 %v3374_v55, %v1224_v35 }
 0x5b5   : > { %v2901_v36 = vpop.f32.mrf.mxu1 }
 0x5b6   : > { %v1257_v48 = vadd.f32 %v1255_v46, %v1253_v41  ;;  %v1262_v51 = vmul.f32 %v2901_v36, %v3416_v29  ;;  %v3051_v46 = vld [vmem:[%s3816_s14 + $0x28] sm:$0xff]  }
 0x5b7   : > { %v1237_v38 = vpop.f32.mrf.mxu1 }
 0x5b8   : > { %v1258_v42 = vmul.f32 %v3395_v11, %v1237_v38 }
 0x5b9   : > { %v2902_v43 = vpop.f32.mrf.mxu1 }
 0x5ba   : > { %v1260_v49 = vadd.f32 %v1258_v42, %v1256_v45  ;;  %v1263_v52 = vmul.f32 %v2902_v43, %v3416_v29  ;;  %v3049_v43 = vld [vmem:[%s3816_s14 + $0x38] sm:$0xff]   ;;  %v3050_v45 = vld [vmem:[%s3816_s14 + $0x30] sm:$0xff]  }
 0x5bb   : > { %v1240_v47 = vpop.f32.mrf.mxu1 }
 0x5bc   : > { %v1259_v50 = vmul.f32 %v3395_v11, %v1240_v47  ;;  %v1264_v54 = vadd.f32 %v1262_v51, %v1260_v49  ;;  %v3052_v47 = vld [vmem:[%s3816_s14 + $0x20] sm:$0xff]   ;;  %v3054_v49 = vld [vmem:[%s3816_s14 + $0x10] sm:$0xff]  }
 0x5bd   : > { %v3056_v51 = vld [vmem:[%s3816_s14] sm:$0xff]  }
 0x5be   : > { %v1261_v53 = vadd.f32 %v1259_v50, %v1257_v48  ;;  %v3053_v48 = vld [vmem:[%s3816_s14 + $0x18] sm:$0xff]   ;;  %v3055_v50 = vld [vmem:[%s3816_s14 + $0x8] sm:$0xff]  }
 0x5c0   : > { %v1265_v56 = vadd.f32 %v1263_v52, %v1261_v53  ;;  %v2670_v52 = vld [vmem:[%s3815_s13] ss:$0 sm:$0xff] }
 0x5c2   : > { %v1270_v57 = vpack.c.bf16 %v1265_v56, %v1264_v54 }
 0x5c4   : > { %2908 = vmatmul.mubr.msk.bf16.vlgmr.msra.gmra.mxu0 %vm734_vm3, %v1270_v57 }
 0x5c5   : > { %2935 = vmatprep.mubr.msk.bf16.mxu0 %vm3178_vm1, %v3177_v2  ;;  %2920 = vmatpush3.bf16.msra.mxu0 %v3049_v43 }
 0x5c6   : > { %2921 = vmatprep.subr.bf16.mxu0 %v3177_v2 }
 0x5c9   : > { %2922 = vmatpush3.bf16.msra.mxu0 %v3050_v45 }
 0x5ca   : > { %2923 = vmatprep.subr.bf16.mxu0 %v3177_v2 }
 0x5cd   : > { %2924 = vmatpush3.bf16.msra.mxu0 %v3051_v46  ;;  %v3057_v46 = vld [vmem:[%s3808_s6 + $0x38] sm:$0xff]  }
 0x5ce   : > { %2925 = vmatprep.subr.bf16.mxu0 %v3177_v2 }
 0x5d1   : > { %2926 = vmatpush3.bf16.msra.mxu0 %v3052_v47  ;;  %v3058_v47 = vld [vmem:[%s3808_s6 + $0x30] sm:$0xff]  }
 0x5d2   : > { %2927 = vmatprep.subr.bf16.mxu0 %v3177_v2 }
 0x5d5   : > { %2928 = vmatpush3.bf16.msra.mxu0 %v3053_v48 }
 0x5d6   : > { %2929 = vmatprep.subr.bf16.mxu0 %v3177_v2 }
 0x5d9   : > { %2930 = vmatpush3.bf16.msra.mxu0 %v3054_v49 }
 0x5da   : > { %2931 = vmatprep.subr.bf16.mxu0 %v3177_v2 }
 0x5dd   : > { %2932 = vmatpush3.bf16.msra.mxu0 %v3055_v50 }
 0x5de   : > { %2933 = vmatprep.subr.bf16.mxu0 %v3177_v2 }
 0x5e1   : > { %2934 = vmatpush3.bf16.msra.mxu0 %v3056_v51 }
 0x684   : > { %v1320_v58 = vpop.f32.mrf.mxu0 }
 0x685   : > { %v1327_v60 = vadd.f32 %v1320_v58, %v3321_v12 }
 0x686   : > { %v2909_v62 = vpop.f32.mrf.mxu0 }
 0x687   : > { %v3502_v63 = vadd.f32 %v2667_v59, %v1327_v60 }
 0x688   : > { %v1323_v0 = vpop.f32.mrf.mxu0 }
 0x689   : > { %v1328_v1 = vadd.f32 %v1323_v0, %v3328_v18  ;;  %v1340_v3 = vsel %vm734_vm3, %v3502_v63, 0.0 }
 0x68a   : > { %1341 = vadd.xlane.f32.xlu0 %v1340_v3  ;;  %v2910_v4 = vpop.f32.mrf.mxu0 }
 0x68b   : > { %v3507_v5 = vadd.f32 %v2667_v59, %v1328_v1 }
 0x68d   : > { %v1343_v6 = vsel %vm734_vm3, %v3507_v5, 0.0 }
 0x68e   : > { %1344 = vadd.xlane.f32.xlu1 %v1343_v6 }
 0x713   : > { %v1342_v7 = vpop.xlane.xlu0 %1341 }
 0x714   : > { %v1346_v9 = vmul.f32 0.03125, %v1342_v7 }
 0x716   : > { %v1348_v12 = vsub.f32 %v3502_v63, %v1346_v9 }
 0x717   : > { %v1345_v10 = vpop.xlane.xlu1 %1344 }
 0x718   : > { %v1347_v13 = vmul.f32 0.03125, %v1345_v10  ;;  %v1350_v14 = vmul.f32 %v1348_v12, %v1348_v12 }
 0x71a   : > { %v1349_v18 = vsub.f32 %v3507_v5, %v1347_v13  ;;  %v1352_v15 = vsel %vm734_vm3, %v1350_v14, 0.0 }
 0x71b   : > { %1353 = vadd.xlane.f32.xlu0 %v1352_v15 }
 0x71c   : > { %v1351_v17 = vmul.f32 %v1349_v18, %v1349_v18 }
 0x71e   : > { %v1355_v19 = vsel %vm734_vm3, %v1351_v17, 0.0 }
 0x71f   : > { %1356 = vadd.xlane.f32.xlu1 %v1355_v19 }
 0x7a4   : > { %v1354_v23 = vpop.xlane.xlu0 %1353 }
 0x7a5   : > { %v1358_v24 = vmul.f32 0.03125, %v1354_v23 }
 0x7a7   : > { %v1360_v25 = vadd.f32 1e-05, %v1358_v24  ;;  %v2682_v24 = vld [vmem:[%s3817_s15] ss:$0 sm:$0xff] }
 0x7a8   : > { %v1357_v26 = vpop.xlane.xlu1 %1356 }
 0x7a9   : > { %3113 = vrsqrt.f32 %v1360_v25  ;;  %v1359_v27 = vmul.f32 0.03125, %v1357_v26 }
 0x7ab   : > { %v1361_v28 = vadd.f32 1e-05, %v1359_v27 }
 0x7ad   : > { %3115 = vrsqrt.f32 %v1361_v28 }
 0x7b6   : > { %v3114_v30 = vpop.eup %3113 }
 0x7b7   : > { %v1364_v31 = vmul.f32 %v3114_v30, %v1348_v12 }
 0x7b9   : > { %v1372_v35 = vmul.f32 %v2668_v32, %v1364_v31 }
 0x7ba   : > { %v3116_v33 = vpop.eup %3115 }
 0x7bb   : > { %v1365_v36 = vmul.f32 %v3116_v33, %v1349_v18  ;;  %v1380_v39 = vadd.f32 %v2669_v37, %v1372_v35 }
 0x7bd   : > { %v1373_v38 = vmul.f32 %v2668_v32, %v1365_v36 }
 0x7bf   : > { %v1381_v41 = vadd.f32 %v2669_v37, %v1373_v38 }
 0x7c1   : > { %v1386_v42 = vpack.c.bf16 %v1381_v41, %v1380_v39 }
 0x7c3   : > { %2916 = vmatmul.mubr.msk.bf16.vlgmr.msra.gmra.mxu1 %vm734_vm3, %v1386_v42 }
 0x7c4   : > { %2943 = vmatprep.mubr.msk.bf16.mxu1 %vm3178_vm1, %v3177_v2  ;;  %2940 = vmatpush3.bf16.msra.mxu1 %v3057_v46 }
 0x7c5   : > { %2941 = vmatprep.subr.bf16.mxu1 %v3177_v2 }
 0x7c8   : > { %2942 = vmatpush3.bf16.msra.mxu1 %v3058_v47 }
 0x7c9   : > { %2947 = vmatprep.subr.bf16.mxu1 %v3177_v2 }
 0x883   : > { %v1443_v53 = vpop.f32.mrf.mxu1 }
 0x884   : > { %v1444_v54 = vadd.f32 %v2670_v52, %v1443_v53 }
 0x885   : > { %v2917_v56 = vpop.f32.mrf.mxu1 }
 0x886   : > { %v1452_v57 = vmul.f32 0.044715, %v1444_v54  ;;  %v1450_v18 = vmul.f32 0.5, %v1444_v54 }
 0x887   : > { %v1446_v58 = vpop.f32.mrf.mxu1 }
 0x888   : > { %v1454_v59 = vmul.f32 %v1452_v57, %v1444_v54  ;;  %v1447_v60 = vadd.f32 %v2670_v52, %v1446_v58  ;;  %v2685_v57 = vld [vmem:[%s3834_s2 + $0x1] ss:$0 sm:$0xff] }
 0x889   : > { %v2918_v62 = vpop.f32.mrf.mxu1 }
 0x88a   : > { %v1456_v0 = vmul.f32 %v1454_v59, %v1444_v54  ;;  %v1453_v1 = vmul.f32 0.044715, %v1447_v60  ;;  %v1451_v15 = vmul.f32 0.5, %v1447_v60  ;;  %v2686_v62 = vld [vmem:[%s3807_s5 + $0x1] ss:$0 sm:$0xff] }
 0x88c   : > { %v1458_v3 = vadd.f32 %v1456_v0, %v1444_v54  ;;  %v1455_v4 = vmul.f32 %v1453_v1, %v1447_v60 }
 0x88e   : > { %v1460_v6 = vmul.f32 0.7978846, %v1458_v3  ;;  %v1457_v7 = vmul.f32 %v1455_v4, %v1447_v60  ;;  %v3059_v4 = vld [vmem:[%s3808_s6 + $0x48] sm:$0xff]  }
 0x890   : > { %3117 = vtanh.f32 %v1460_v6  ;;  %v1459_v9 = vadd.f32 %v1457_v7, %v1447_v60  ;;  %v3060_v7 = vld [vmem:[%s3808_s6 + $0x40] sm:$0xff]  }
 0x892   : > { %v1461_v12 = vmul.f32 0.7978846, %v1459_v9  ;;  %v3061_v9 = vld [vmem:[%s3808_s6 + $0x58] sm:$0xff]  }
 0x894   : > { %3119 = vtanh.f32 %v1461_v12  ;;  %v3062_v12 = vld [vmem:[%s3808_s6 + $0x50] sm:$0xff]  }
 0x89d   : > { %v3118_v10 = vpop.eup %3117 }
 0x89e   : > { %v1464_v13 = vadd.f32 1.0, %v3118_v10  ;;  %v2692_v10 = vld [vmem:[%s3809_s7 + $0x3] ss:$0 sm:$0xff] }
 0x8a0   : > { %v1466_v19 = vmul.f32 %v1464_v13, %v1450_v18 }
 0x8a1   : > { %v3120_v14 = vpop.eup %3119 }
 0x8a2   : > { %v1465_v17 = vadd.f32 1.0, %v3120_v14 }
 0x8a4   : > { %v1467_v20 = vmul.f32 %v1465_v17, %v1451_v15 }
 0x8a6   : > { %v1484_v22 = vpack.c.bf16 %v1467_v20, %v1466_v19 }
 0x8a8   : > { %2936 = vmatmul.mubr.bf16.vlgmr.msra.gmra.mxu0 %v1484_v22 }
 0x968   : > { %v1567_v23 = vpop.f32.mrf.mxu0 }
 0x969   : > { %v1574_v25 = vadd.f32 %v1567_v23, %v3502_v63 }
 0x96a   : > { %v2937_v26 = vpop.f32.mrf.mxu0 }
 0x96b   : > { %v3570_v27 = vadd.f32 %v2682_v24, %v1574_v25  ;;  %v2701_v25 = vld [vmem:[%s3809_s7 + $0x4] ss:$0 sm:$0xff] }
 0x96c   : > { %v1570_v28 = vpop.f32.mrf.mxu0 }
 0x96d   : > { %v1575_v30 = vadd.f32 %v1570_v28, %v3507_v5  ;;  %v1589_v31 = vsel %vm734_vm3, %v3570_v27, 0.0 }
 0x96e   : > { %1590 = vadd.xlane.f32.xlu0 %v1589_v31  ;;  %v2938_v32 = vpop.f32.mrf.mxu0 }
 0x96f   : > { %v3575_v33 = vadd.f32 %v2682_v24, %v1575_v30 }
 0x971   : > { %v1592_v35 = vsel %vm734_vm3, %v3575_v33, 0.0 }
 0x972   : > { %1593 = vadd.xlane.f32.xlu1 %v1592_v35 }
 0x9f7   : > { %v1591_v36 = vpop.xlane.xlu0 %1590 }
 0x9f8   : > { %v1595_v37 = vmul.f32 0.03125, %v1591_v36 }
 0x9fa   : > { %v1597_v63 = vsub.f32 %v3570_v27, %v1595_v37 }
 0x9fb   : > { %v1594_v38 = vpop.xlane.xlu1 %1593 }
 0x9fc   : > { %v1596_v39 = vmul.f32 0.03125, %v1594_v38  ;;  %v1599_v41 = vmul.f32 %v1597_v63, %v1597_v63 }
 0x9fe   : > { %v1598_v5 = vsub.f32 %v3575_v33, %v1596_v39  ;;  %v1601_v42 = vsel %vm734_vm3, %v1599_v41, 0.0 }
 0x9ff   : > { %1602 = vadd.xlane.f32.xlu0 %v1601_v42 }
 0xa00   : > { %v1600_v43 = vmul.f32 %v1598_v5, %v1598_v5 }
 0xa02   : > { %v1604_v45 = vsel %vm734_vm3, %v1600_v43, 0.0 }
 0xa03   : > { %1605 = vadd.xlane.f32.xlu1 %v1604_v45 }
 0xa88   : > { %v1603_v48 = vpop.xlane.xlu0 %1602 }
 0xa89   : > { %v1607_v49 = vmul.f32 0.03125, %v1603_v48 }
 0xa8b   : > { %v1609_v50 = vadd.f32 1e-05, %v1607_v49 }
 0xa8c   : > { %v1606_v51 = vpop.xlane.xlu1 %1605 }
 0xa8d   : > { %3121 = vrsqrt.f32 %v1609_v50  ;;  %v1608_v52 = vmul.f32 0.03125, %v1606_v51 }
 0xa8f   : > { %v1610_v53 = vadd.f32 1e-05, %v1608_v52 }
 0xa91   : > { %3123 = vrsqrt.f32 %v1610_v53 }
 0xa9a   : > { %v3122_v54 = vpop.eup %3121 }
 0xa9b   : > { %v1613_v56 = vmul.f32 %v3122_v54, %v1597_v63 }
 0xa9d   : > { %v1621_v60 = vmul.f32 %v2685_v57, %v1613_v56 }
 0xa9e   : > { %v3124_v58 = vpop.eup %3123 }
 0xa9f   : > { %v1614_v59 = vmul.f32 %v3124_v58, %v1598_v5  ;;  %v1629_v1 = vadd.f32 %v2686_v62, %v1621_v60 }
 0xaa1   : > { %v1622_v0 = vmul.f32 %v2685_v57, %v1614_v59 }
 0xaa3   : > { %v1630_v3 = vadd.f32 %v2686_v62, %v1622_v0 }
 0xaa5   : > { %v1631_v6 = vpack.c.bf16 %v1630_v3, %v1629_v1 }
 0xaa7   : > { %2944 = vmatmul.mubr.msk.bf16.vlgmr.msra.gmra.mxu1 %vm734_vm3, %v1631_v6 }
 0xaa8   : > { %2948 = vmatpush3.bf16.msra.mxu1 %v3059_v4  ;;  %2951 = vmatprep.mubr.msk.bf16.mxu1 %vm3178_vm1, %v3177_v2 }
 0xaa9   : > { %2949 = vmatprep.subr.bf16.mxu1 %v3177_v2 }
 0xaac   : > { %2950 = vmatpush3.bf16.msra.mxu1 %v3060_v7 }
 0xaad   : > { %2955 = vmatprep.subr.bf16.mxu1 %v3177_v2 }
 0xaaf   : > { %2952 = vmatmul.mubr.msk.bf16.vlgmr.msra.gmra.mxu1 %vm734_vm3, %v1631_v6 }
 0xab0   : > { %2956 = vmatpush3.bf16.msra.mxu1 %v3061_v9  ;;  %2959 = vmatprep.mubr.msk.bf16.mxu1 %vm3178_vm1, %v3177_v2 }
 0xab1   : > { %2957 = vmatprep.subr.bf16.mxu1 %v3177_v2 }
 0xab4   : > { %2958 = vmatpush3.bf16.msra.mxu1 %v3062_v12 }
 0xab7   : > { %2960 = vmatmul.mubr.msk.bf16.vlgmr.msra.gmra.mxu1 %vm734_vm3, %v1631_v6 }
 0xb67   : > { %v1694_v13 = vpop.f32.mrf.mxu1 }
 0xb68   : > { %v1695_v18 = vadd.f32 %v2692_v10, %v1694_v13 }
 0xb69   : > { %v2945_v14 = vpop.f32.mrf.mxu1 }
 0xb6a   : > { %v1835_v20 = vmul.f32 %v1695_v18, %v3384_v61  ;;  %v1837_v5 = vmul.f32 %v1695_v18, %v3400_v16  ;;  %v1839_v45 = vmul.f32 %v1695_v18, %v3408_v21 }
 0xb6b   : > { %v1697_v15 = vpop.f32.mrf.mxu1 }
 0xb6c   : > { %v1698_v17 = vadd.f32 %v2692_v10, %v1697_v15 }
 0xb6d   : > { %v2946_v19 = vpop.f32.mrf.mxu1 }
 0xb6e   : > { %v1836_v22 = vmul.f32 %v1698_v17, %v3384_v61  ;;  %v2710_v61 = vld [vmem:[%s3809_s7 + $0x5] ss:$0 sm:$0xff]  ;;  %v1838_v38 = vmul.f32 %v1698_v17, %v3400_v16  ;;  %v1840_v39 = vmul.f32 %v1698_v17, %v3408_v21  ;;  %v1842_v50 = vmul.f32 %v1698_v17, %v3420_v34 }
 0xb6f   : > { %v1760_v23 = vpop.f32.mrf.mxu1  ;;  %v1841_v16 = vmul.f32 %v1695_v18, %v3420_v34 }
 0xb70   : > { %v1843_v24 = vpack.c.bf16 %v1836_v22, %v1835_v20  ;;  %v1761_v30 = vadd.f32 %v2701_v25, %v1760_v23  ;;  %v1844_v47 = vpack.c.bf16 %v1838_v38, %v1837_v5  ;;  %v1845_v49 = vpack.c.bf16 %v1840_v39, %v1839_v45 }
 0xb71   : > { %v2953_v26 = vpop.f32.mrf.mxu1  ;;  %v1846_v51 = vpack.c.bf16 %v1842_v50, %v1841_v16 }
 0xb72   : > { %2965 = vmatprep.mubr.msk.bf16.mxu1 %vm734_vm3, %v1843_v24 }
 0xb73   : > { %v1763_v28 = vpop.f32.mrf.mxu1 }
 0xb74   : > { %v1764_v31 = vadd.f32 %v2701_v25, %v1763_v28 }
 0xb75   : > { %v2954_v32 = vpop.f32.mrf.mxu1 }
 0xb76   : > { %v1833_v35 = vpack.c.bf16 %v1764_v31, %v1761_v30 }
 0xb77   : > { %v1826_v36 = vpop.f32.mrf.mxu1 }
 0xb78   : > { %3028 = vmatprep.subr.msk.bf16.mxu1 %vm734_vm3, %v1833_v35  ;;  %v1860_v37 = vsel %vm734_vm3, %v1833_v35, 0  ;;  %v1827_v42 = vadd.f32 %v2710_v61, %v1826_v36 }
 0xb79   : > { %v2961_v63 = vpop.f32.mrf.mxu1  ;;  %2964 = vmatpush3.bf16.xpose.msra.mxu1 %v1860_v37 }
 0xb7a   : > { %2999 = vmatprep.subr.bf16.mxu1 %v3177_v2 }
 0xb7b   : > { %v1829_v41 = vpop.f32.mrf.mxu1 }
 0xb7c   : > { %v1830_v43 = vadd.f32 %v2710_v61, %v1829_v41 }
 0xb7d   : > { %v2962_v46 = vpop.f32.mrf.mxu1 }
 0xb7e   : > { %v1834_v48 = vpack.c.bf16 %v1830_v43, %v1827_v42 }
 0xb80   : > { %2966 = vmatmul.mubr.msk.bf16.vlgmr.msra.gmra.mxu1 %vm734_vm3, %v1844_v47  ;;  %2973 = vmatprep.subr.bf16.mxu0 %v1834_v48 }
 0xb81   : > { %2969 = vmatprep.mubr.msk.bf16.mxu1 %vm734_vm3, %v1845_v49  ;;  %2974 = vmatpush3.bf16.msra.mxu0 %v1834_v48 }
 0xb82   : > { %2983 = vmatprep.subr.bf16.mxu0 %v3177_v2 }
 0xb88   : > { %2970 = vmatmul.mubr.msk.bf16.gmra.mxu1 %vm734_vm3, %v1846_v51 }
 0xb89   : > { %3015 = vmatprep.mubr.msk.bf16.mxu1 %vm3178_vm1, %v3177_v2 }
 0xc40   : > { %v2967_v21 = vpop.f32.mrf.mxu1 }
 0xc41   : > { %v1929_v57 = vsel %vm1072_vm0, %v2967_v21, -1e+30 }
 0xc42   : > { %v1896_v52 = vpop.f32.mrf.mxu1  ;;  %v1941_v60 = vsel %vm1082_vm2, %v1929_v57, -inf }
 0xc43   : > { %v1927_v53 = vsel %vm1072_vm0, %v1896_v52, -1e+30 }
 0xc44   : > { %v2968_v54 = vpop.f32.mrf.mxu1  ;;  %v1935_v56 = vsel %vm1082_vm2, %v1927_v53, -inf }
 0xc45   : > { %1936 = vmax.xlane.f32.xlu0 %v1935_v56  ;;  %v1930_v0 = vsel %vm1073_vm4, %v2968_v54, -1e+30 }
 0xc46   : > { %v1899_v58 = vpop.f32.mrf.mxu1  ;;  %v1944_v6 = vsel %vm1082_vm2, %v1930_v0, -inf }
 0xc47   : > { %v1928_v34 = vsel %vm1073_vm4, %v1899_v58, -1e+30 }
 0xc48   : > { %v2971_v59 = vpop.f32.mrf.mxu1  ;;  %v1938_v62 = vsel %vm1082_vm2, %v1928_v34, -inf }
 0xc49   : > { %1942 = vmax.xlane.f32.xlu0 %v1941_v60  ;;  %1939 = vmax.xlane.f32.xlu1 %v1938_v62  ;;  %v1933_v9 = vsel %vm1072_vm0, %v2971_v59, -1e+30 }
 0xc4a   : > { %v1912_v1 = vpop.f32.mrf.mxu1  ;;  %v1953_v13 = vsel %vm1082_vm2, %v1933_v9, -inf }
 0xc4b   : > { %v1931_v3 = vsel %vm1072_vm0, %v1912_v1, -1e+30 }
 0xc4c   : > { %v2972_v4 = vpop.f32.mrf.mxu1  ;;  %v1947_v7 = vsel %vm1082_vm2, %v1931_v3, -inf }
 0xc4d   : > { %1945 = vmax.xlane.f32.xlu1 %v1944_v6  ;;  %1948 = vmax.xlane.f32.xlu0 %v1947_v7  ;;  %v1934_v18 = vsel %vm1073_vm4, %v2972_v4, -1e+30 }
 0xc4e   : > { %v1915_v12 = vpop.f32.mrf.mxu1  ;;  %v1956_v15 = vsel %vm1082_vm2, %v1934_v18, -inf }
 0xc4f   : > { %v1932_v10 = vsel %vm1073_vm4, %v1915_v12, -1e+30 }
 0xc50   : > { %v1950_v14 = vsel %vm1082_vm2, %v1932_v10, -inf }
 0xc51   : > { %1954 = vmax.xlane.f32.xlu0 %v1953_v13  ;;  %1951 = vmax.xlane.f32.xlu1 %v1950_v14 }
 0xc55   : > { %1957 = vmax.xlane.f32.xlu1 %v1956_v15 }
 0xcce   : > { %v1937_v40 = vpop.xlane.xlu0 %1936 }
 0xccf   : > { %v1959_v17 = vsub.f32 %v1927_v53, %v1937_v40 }
 0xcd1   : > { %v1967_v19 = vmul.f32 1.442695, %v1959_v17 }
 0xcd2   : > { %v1943_v20 = vpop.xlane.xlu0 %1942  ;;  %v1940_v22 = vpop.xlane.xlu1 %1939 }
 0xcd3   : > { %3125 = vpow2.f32 %v1967_v19  ;;  %v1961_v23 = vsub.f32 %v1929_v57, %v1943_v20  ;;  %v1960_v24 = vsub.f32 %v1928_v34, %v1940_v22 }
 0xcd5   : > { %v1971_v25 = vmul.f32 1.442695, %v1961_v23  ;;  %v1969_v26 = vmul.f32 1.442695, %v1960_v24 }
 0xcd6   : > { %v1946_v28 = vpop.xlane.xlu1 %1945  ;;  %v1949_v30 = vpop.xlane.xlu0 %1948 }
 0xcd7   : > { %3127 = vpow2.f32 %v1971_v25  ;;  %v1962_v44 = vsub.f32 %v1930_v0, %v1946_v28  ;;  %v1963_v31 = vsub.f32 %v1931_v3, %v1949_v30 }
 0xcd8   : > { %3129 = vpow2.f32 %v1969_v26 }
 0xcd9   : > { %v1973_v32 = vmul.f32 1.442695, %v1962_v44  ;;  %v1975_v35 = vmul.f32 1.442695, %v1963_v31  ;;  %v3063_v44 = vld [vmem:[%s3810_s8 + $0x18] sm:$0xff]   ;;  %v3064_v31 = vld [vmem:[%s3810_s8 + $0x10] sm:$0xff]  }
 0xcda   : > { %v1955_v36 = vpop.xlane.xlu0 %1954  ;;  %v1952_v37 = vpop.xlane.xlu1 %1951 }
 0xcdb   : > { %3131 = vpow2.f32 %v1973_v32  ;;  %v1965_v61 = vsub.f32 %v1933_v9, %v1955_v36  ;;  %v1964_v63 = vsub.f32 %v1932_v10, %v1952_v37 }
 0xcdc   : > { %3133 = vpow2.f32 %v1975_v35 }
 0xcdd   : > { %v1979_v38 = vmul.f32 1.442695, %v1965_v61  ;;  %v1977_v39 = vmul.f32 1.442695, %v1964_v63 }
 0xcde   : > { %v1958_v41 = vpop.xlane.xlu1 %1957 }
 0xcdf   : > { %3135 = vpow2.f32 %v1979_v38  ;;  %v1966_v5 = vsub.f32 %v1934_v18, %v1958_v41 }
 0xce0   : > { %v3126_v42 = vpop.eup %3125  ;;  %3137 = vpow2.f32 %v1977_v39 }
 0xce1   : > { %v1981_v43 = vmul.f32 1.442695, %v1966_v5  ;;  %v1983_v45 = vsel %vm1082_vm2, %v3126_v42, 0.0 }
 0xce2   : > { %1984 = vadd.xlane.f32.xlu0 %v1983_v45 }
 0xce3   : > { %3139 = vpow2.f32 %v1981_v43 }
 0xce4   : > { %v3128_v46 = vpop.eup %3127 }
 0xce5   : > { %v3130_v47 = vpop.eup %3129  ;;  %v1989_v48 = vsel %vm1082_vm2, %v3128_v46, 0.0 }
 0xce6   : > { %1990 = vadd.xlane.f32.xlu0 %v1989_v48  ;;  %v1986_v49 = vsel %vm1082_vm2, %v3130_v47, 0.0 }
 0xce7   : > { %1987 = vadd.xlane.f32.xlu1 %v1986_v49 }
 0xce8   : > { %v3132_v50 = vpop.eup %3131 }
 0xce9   : > { %v3134_v16 = vpop.eup %3133  ;;  %v1992_v51 = vsel %vm1082_vm2, %v3132_v50, 0.0 }
 0xcea   : > { %v1995_v21 = vsel %vm1082_vm2, %v3134_v16, 0.0 }
 0xceb   : > { %1996 = vadd.xlane.f32.xlu0 %v1995_v21  ;;  %1993 = vadd.xlane.f32.xlu1 %v1992_v51 }
 0xcec   : > { %v3136_v52 = vpop.eup %3135 }
 0xced   : > { %v3138_v53 = vpop.eup %3137  ;;  %v2001_v54 = vsel %vm1082_vm2, %v3136_v52, 0.0 }
 0xcee   : > { %v1998_v56 = vsel %vm1082_vm2, %v3138_v53, 0.0 }
 0xcef   : > { %2002 = vadd.xlane.f32.xlu0 %v2001_v54  ;;  %1999 = vadd.xlane.f32.xlu1 %v1998_v56 }
 0xcf0   : > { %v3140_v57 = vpop.eup %3139 }
 0xcf1   : > { %v2004_v58 = vsel %vm1082_vm2, %v3140_v57, 0.0 }
 0xcf3   : > { %2005 = vadd.xlane.f32.xlu1 %v2004_v58 }
 0xd6b   : > { %v1985_v34 = vpop.xlane.xlu0 %1984 }
 0xd6c   : > { %3141 = vrcp.f32 %v1985_v34 }
 0xd6f   : > { %v1991_v59 = vpop.xlane.xlu0 %1990 }
 0xd70   : > { %v1988_v60 = vpop.xlane.xlu1 %1987 }
 0xd71   : > { %3143 = vrcp.f32 %v1988_v60 }
 0xd72   : > { %3145 = vrcp.f32 %v1991_v59 }
 0xd74   : > { %v1997_v62 = vpop.xlane.xlu0 %1996  ;;  %v1994_v0 = vpop.xlane.xlu1 %1993 }
 0xd75   : > { %3147 = vrcp.f32 %v1994_v0 }
 0xd76   : > { %3149 = vrcp.f32 %v1997_v62 }
 0xd78   : > { %v2003_v1 = vpop.xlane.xlu0 %2002  ;;  %v2000_v3 = vpop.xlane.xlu1 %1999 }
 0xd79   : > { %3151 = vrcp.f32 %v2000_v3  ;;  %v3142_v4 = vpop.eup %3141 }
 0xd7a   : > { %3153 = vrcp.f32 %v2003_v1  ;;  %v2015_v9 = vmul.f32 %v3142_v4, %v3126_v42 }
 0xd7c   : > { %v2006_v6 = vpop.xlane.xlu1 %2005 }
 0xd7d   : > { %3155 = vrcp.f32 %v2006_v6 }
 0xd7e   : > { %v3144_v7 = vpop.eup %3143 }
 0xd7f   : > { %v2016_v12 = vmul.f32 %v3144_v7, %v3130_v47  ;;  %v3146_v10 = vpop.eup %3145 }
 0xd80   : > { %v2017_v18 = vmul.f32 %v3146_v10, %v3128_v46  ;;  %v3066_v10 = vld [vmem:[%s3814_s12 + $0x10] sm:$0xff]  }
 0xd81   : > { %v2023_v13 = vpack.c.bf16 %v2016_v12, %v2015_v9  ;;  %v3065_v12 = vld [vmem:[%s3814_s12 + $0x18] sm:$0xff]  }
 0xd82   : > { %v3148_v14 = vpop.eup %3147 }
 0xd83   : > { %2975 = vmatprep.mubr.msk.bf16.mxu0 %vm1082_vm2, %v2023_v13  ;;  %v2018_v15 = vmul.f32 %v3148_v14, %v3132_v50  ;;  %v3150_v40 = vpop.eup %3149 }
 0xd84   : > { %v2019_v22 = vmul.f32 %v3150_v40, %v3134_v16 }
 0xd85   : > { %v2024_v17 = vpack.c.bf16 %v2018_v15, %v2017_v18 }
 0xd86   : > { %v3152_v19 = vpop.eup %3151 }
 0xd87   : > { %v3154_v20 = vpop.eup %3153  ;;  %2976 = vmatmul.mubr.msk.bf16.vlgmr.msra.gmra.mxu0 %vm1082_vm2, %v2024_v17  ;;  %v2020_v23 = vmul.f32 %v3152_v19, %v3138_v53 }
 0xd88   : > { %v2021_v26 = vmul.f32 %v3154_v20, %v3136_v52  ;;  %2984 = vmatpush3.bf16.msra.mxu0 %v3063_v44 }
 0xd89   : > { %v2025_v25 = vpack.c.bf16 %v2020_v23, %v2019_v22  ;;  %2985 = vmatprep.subr.bf16.mxu0 %v3177_v2  ;;  %v2733_v22 = vld [vmem:[%s3812_s10 + $0x1] ss:$0 sm:$0xff] }
 0xd8a   : > { %v3156_v24 = vpop.eup %3155 }
 0xd8b   : > { %v2022_v28 = vmul.f32 %v3156_v24, %v3140_v57  ;;  %2979 = vmatprep.mubr.msk.bf16.mxu0 %vm1082_vm2, %v2025_v25 }
 0xd8c   : > { %2986 = vmatpush3.bf16.msra.mxu0 %v3064_v31 }
 0xd8d   : > { %v2026_v30 = vpack.c.bf16 %v2022_v28, %v2021_v26  ;;  %2991 = vmatprep.subr.bf16.mxu0 %v3177_v2  ;;  %v2734_v26 = vld [vmem:[%s3813_s11 + $0x1] ss:$0 sm:$0xff] }
 0xd8f   : > { %2980 = vmatmul.mubr.msk.bf16.gmra.mxu0 %vm1082_vm2, %v2026_v30 }
 0xd90   : > { %2987 = vmatprep.mubr.msk.bf16.mxu0 %vm3178_vm1, %v3177_v2 }
 0xe47   : > { %v2977_v32 = vpop.f32.mrf.mxu0 }
 0xe48   : > { %v2106_v39 = vmul.f32 %v2977_v32, %v3390_v8  ;;  %v3067_v32 = vld [vmem:[%s3816_s14 + $0x78] sm:$0xff]  }
 0xe49   : > { %v2073_v35 = vpop.f32.mrf.mxu0  ;;  %3000 = vmatpush3.bf16.msra.mxu1 %v3067_v32 }
 0xe4a   : > { %v2104_v63 = vmul.f32 %v3374_v55, %v2073_v35  ;;  %3001 = vmatprep.subr.bf16.mxu1 %v3177_v2  ;;  %v3068_v35 = vld [vmem:[%s3816_s14 + $0x70] sm:$0xff]  }
 0xe4b   : > { %v2978_v36 = vpop.f32.mrf.mxu0 }
 0xe4c   : > { %v2108_v43 = vadd.f32 %v2106_v39, %v2104_v63  ;;  %v2107_v45 = vmul.f32 %v2978_v36, %v3390_v8  ;;  %v2730_v8 = vld [vmem:[%s3811_s9 + $0x1] ss:$0 sm:$0xff]  ;;  %v3069_v36 = vld [vmem:[%s3816_s14 + $0x68] sm:$0xff]   ;;  %v3072_v63 = vld [vmem:[%s3816_s14 + $0x50] sm:$0xff]  }
 0xe4d   : > { %v2076_v37 = vpop.f32.mrf.mxu0  ;;  %3002 = vmatpush3.bf16.msra.mxu1 %v3068_v35  ;;  %v3074_v39 = vld [vmem:[%s3816_s14 + $0x40] sm:$0xff]  }
 0xe4e   : > { %v2105_v41 = vmul.f32 %v3374_v55, %v2076_v37  ;;  %3003 = vmatprep.subr.bf16.mxu1 %v3177_v2  ;;  %v3070_v37 = vld [vmem:[%s3816_s14 + $0x60] sm:$0xff]  }
 0xe4f   : > { %v2981_v61 = vpop.f32.mrf.mxu0 }
 0xe50   : > { %v2109_v47 = vadd.f32 %v2107_v45, %v2105_v41  ;;  %v2114_v50 = vmul.f32 %v2981_v61, %v3416_v29  ;;  %v3071_v61 = vld [vmem:[%s3816_s14 + $0x58] sm:$0xff]   ;;  %v2740_v41 = vld [vmem:[%s3815_s13 + $0x1] ss:$0 sm:$0xff] }
 0xe51   : > { %v2089_v38 = vpop.f32.mrf.mxu0  ;;  %3004 = vmatpush3.bf16.msra.mxu1 %v3069_v36  ;;  %v2770_v36 = vld [vmem:[%s3818_s16] ss:$0 sm:$0xff] }
 0xe52   : > { %v2110_v5 = vmul.f32 %v3395_v11, %v2089_v38  ;;  %3005 = vmatprep.subr.bf16.mxu1 %v3177_v2  ;;  %v3073_v38 = vld [vmem:[%s3816_s14 + $0x48] sm:$0xff]  }
 0xe53   : > { %v2982_v42 = vpop.f32.mrf.mxu0 }
 0xe54   : > { %v2112_v48 = vadd.f32 %v2110_v5, %v2108_v43  ;;  %v2115_v16 = vmul.f32 %v2982_v42, %v3416_v29 }
 0xe55   : > { %v2092_v46 = vpop.f32.mrf.mxu0  ;;  %3006 = vmatpush3.bf16.msra.mxu1 %v3070_v37 }
 0xe56   : > { %v2111_v49 = vmul.f32 %v3395_v11, %v2092_v46  ;;  %v2116_v21 = vadd.f32 %v2114_v50, %v2112_v48  ;;  %3007 = vmatprep.subr.bf16.mxu1 %v3177_v2 }
 0xe58   : > { %v2113_v51 = vadd.f32 %v2111_v49, %v2109_v47 }
 0xe59   : > { %3008 = vmatpush3.bf16.msra.mxu1 %v3071_v61 }
 0xe5a   : > { %v2117_v52 = vadd.f32 %v2115_v16, %v2113_v51  ;;  %3009 = vmatprep.subr.bf16.mxu1 %v3177_v2 }
 0xe5c   : > { %v2123_v53 = vpack.c.bf16 %v2117_v52, %v2116_v21 }
 0xe5d   : > { %3010 = vmatpush3.bf16.msra.mxu1 %v3072_v63 }
 0xe5e   : > { %2988 = vmatmul.mubr.msk.bf16.vlgmr.msra.gmra.mxu0 %vm734_vm3, %v2123_v53  ;;  %3011 = vmatprep.subr.bf16.mxu1 %v3177_v2 }
 0xe5f   : > { %2995 = vmatprep.mubr.msk.bf16.mxu0 %vm3178_vm1, %v3177_v2  ;;  %2992 = vmatpush3.bf16.msra.mxu0 %v3065_v12 }
 0xe60   : > { %2993 = vmatprep.subr.bf16.mxu0 %v3177_v2 }
 0xe61   : > { %3012 = vmatpush3.bf16.msra.mxu1 %v3073_v38 }
 0xe62   : > { %3013 = vmatprep.subr.bf16.mxu1 %v3177_v2 }
 0xe63   : > { %2994 = vmatpush3.bf16.msra.mxu0 %v3066_v10 }
 0xe64   : > { %3019 = vmatprep.subr.bf16.mxu0 %v3177_v2 }
 0xe65   : > { %3014 = vmatpush3.bf16.msra.mxu1 %v3074_v39 }
 0xf1e   : > { %v2173_v55 = vpop.f32.mrf.mxu0 }
 0xf1f   : > { %v2180_v11 = vadd.f32 %v2173_v55, %v3570_v27 }
 0xf20   : > { %v2989_v54 = vpop.f32.mrf.mxu0 }
 0xf21   : > { %v3707_v56 = vadd.f32 %v2730_v8, %v2180_v11 }
 0xf22   : > { %v2176_v29 = vpop.f32.mrf.mxu0 }
 0xf23   : > { %v2181_v57 = vadd.f32 %v2176_v29, %v3575_v33  ;;  %v2196_v58 = vsel %vm734_vm3, %v3707_v56, 0.0 }
 0xf24   : > { %2197 = vadd.xlane.f32.xlu0 %v2196_v58  ;;  %v2990_v34 = vpop.f32.mrf.mxu0 }
 0xf25   : > { %v3712_v59 = vadd.f32 %v2730_v8, %v2181_v57 }
 0xf27   : > { %v2199_v60 = vsel %vm734_vm3, %v3712_v59, 0.0 }
 0xf28   : > { %2200 = vadd.xlane.f32.xlu1 %v2199_v60 }
 0xfad   : > { %v2198_v62 = vpop.xlane.xlu0 %2197 }
 0xfae   : > { %v2202_v0 = vmul.f32 0.03125, %v2198_v62 }
 0xfb0   : > { %v2204_v27 = vsub.f32 %v3707_v56, %v2202_v0 }
 0xfb1   : > { %v2201_v1 = vpop.xlane.xlu1 %2200 }
 0xfb2   : > { %v2203_v3 = vmul.f32 0.03125, %v2201_v1  ;;  %v2206_v4 = vmul.f32 %v2204_v27, %v2204_v27  ;;  %v2769_v1 = vld [vmem:[%s3817_s15 + $0x1] ss:$0 sm:$0xff] }
 0xfb4   : > { %v2205_v33 = vsub.f32 %v3712_v59, %v2203_v3  ;;  %v2208_v6 = vsel %vm734_vm3, %v2206_v4, 0.0 }
 0xfb5   : > { %2209 = vadd.xlane.f32.xlu0 %v2208_v6 }
 0xfb6   : > { %v2207_v7 = vmul.f32 %v2205_v33, %v2205_v33 }
 0xfb8   : > { %v2211_v9 = vsel %vm734_vm3, %v2207_v7, 0.0 }
 0xfb9   : > { %2212 = vadd.xlane.f32.xlu1 %v2211_v9 }
0x103e   : > { %v2210_v13 = vpop.xlane.xlu0 %2209 }
0x103f   : > { %v2214_v14 = vmul.f32 0.03125, %v2210_v13 }
0x1041   : > { %v2216_v18 = vadd.f32 1e-05, %v2214_v14 }
0x1042   : > { %v2213_v15 = vpop.xlane.xlu1 %2212 }
0x1043   : > { %3157 = vrsqrt.f32 %v2216_v18  ;;  %v2215_v40 = vmul.f32 0.03125, %v2213_v15 }
0x1045   : > { %v2217_v17 = vadd.f32 1e-05, %v2215_v40 }
0x1047   : > { %3159 = vrsqrt.f32 %v2217_v17 }
0x1050   : > { %v3158_v19 = vpop.eup %3157 }
0x1051   : > { %v2220_v20 = vmul.f32 %v3158_v19, %v2204_v27 }
0x1053   : > { %v2228_v25 = vmul.f32 %v2733_v22, %v2220_v20 }
0x1054   : > { %v3160_v23 = vpop.eup %3159 }
0x1055   : > { %v2221_v24 = vmul.f32 %v3160_v23, %v2205_v33  ;;  %v2236_v30 = vadd.f32 %v2734_v26, %v2228_v25  ;;  %v3075_v23 = vld [vmem:[%s3820_s18 + $0x8] sm:$0xff]  }
0x1057   : > { %v2229_v28 = vmul.f32 %v2733_v22, %v2221_v24  ;;  %v3076_v24 = vld [vmem:[%s3820_s18] sm:$0xff]  }
0x1059   : > { %v2237_v44 = vadd.f32 %v2734_v26, %v2229_v28 }
0x105b   : > { %v2243_v31 = vpack.c.bf16 %v2237_v44, %v2236_v30 }
0x105d   : > { %2996 = vmatmul.mubr.msk.bf16.vlgmr.msra.gmra.mxu0 %vm734_vm3, %v2243_v31 }
0x105e   : > { %3023 = vmatprep.mubr.msk.bf16.mxu0 %vm3178_vm1, %v3177_v2  ;;  %3020 = vmatpush3.bf16.msra.mxu0 %v3075_v23  ;;  %vm2557_vm1 = vcmask 7168  }
0x105f   : > { %3021 = vmatprep.subr.bf16.mxu0 %v3177_v2  ;;  %v2771_v2 = vld [vmem:[%s3819_s17] ss:$0 sm:$0xff] }
0x1062   : > { %3022 = vmatpush3.bf16.msra.mxu0 %v3076_v24 }
0x111d   : > { %v2301_v5 = vpop.f32.mrf.mxu0 }
0x111e   : > { %v2302_v42 = vadd.f32 %v2740_v41, %v2301_v5 }
0x111f   : > { %v2997_v43 = vpop.f32.mrf.mxu0 }
0x1120   : > { %v2310_v45 = vmul.f32 0.044715, %v2302_v42  ;;  %v2308_v57 = vmul.f32 0.5, %v2302_v42 }
0x1121   : > { %v2304_v46 = vpop.f32.mrf.mxu0 }
0x1122   : > { %v2312_v47 = vmul.f32 %v2310_v45, %v2302_v42  ;;  %v2305_v48 = vadd.f32 %v2740_v41, %v2304_v46 }
0x1123   : > { %v2998_v49 = vpop.f32.mrf.mxu0 }
0x1124   : > { %v2314_v50 = vmul.f32 %v2312_v47, %v2302_v42  ;;  %v2311_v16 = vmul.f32 0.044715, %v2305_v48  ;;  %v2309_v58 = vmul.f32 0.5, %v2305_v48 }
0x1126   : > { %v2316_v51 = vadd.f32 %v2314_v50, %v2302_v42  ;;  %v2313_v21 = vmul.f32 %v2311_v16, %v2305_v48  ;;  %v2772_v42 = vld [vmem:[#allocation2] ss:$0 sm:$0xff] }
0x1128   : > { %v2318_v52 = vmul.f32 0.7978846, %v2316_v51  ;;  %v2315_v53 = vmul.f32 %v2313_v21, %v2305_v48 }
0x112a   : > { %3161 = vtanh.f32 %v2318_v52  ;;  %v2317_v55 = vadd.f32 %v2315_v53, %v2305_v48 }
0x112c   : > { %v2319_v8 = vmul.f32 0.7978846, %v2317_v55 }
0x112e   : > { %3163 = vtanh.f32 %v2319_v8 }
0x1137   : > { %v3162_v11 = vpop.eup %3161 }
0x1138   : > { %v2322_v54 = vadd.f32 1.0, %v3162_v11 }
0x113a   : > { %v2324_v60 = vmul.f32 %v2322_v54, %v2308_v57 }
0x113b   : > { %v3164_v29 = vpop.eup %3163 }
0x113c   : > { %v2323_v34 = vadd.f32 1.0, %v3164_v29 }
0x113e   : > { %v2325_v62 = vmul.f32 %v2323_v34, %v2309_v58 }
0x1140   : > { %v2343_v0 = vpack.c.bf16 %v2325_v62, %v2324_v60 }
0x1142   : > { %3016 = vmatmul.mubr.bf16.vlgmr.msra.gmra.mxu1 %v2343_v0 }
0x1202   : > { %v2426_v27 = vpop.f32.mrf.mxu1 }
0x1203   : > { %v2433_v3 = vadd.f32 %v2426_v27, %v3707_v56 }
0x1204   : > { %v3017_v4 = vpop.f32.mrf.mxu1 }
0x1205   : > { %v2443_v33 = vadd.f32 %v2769_v1, %v2433_v3 }
0x1206   : > { %v2429_v6 = vpop.f32.mrf.mxu1 }
0x1207   : > { %v2434_v7 = vadd.f32 %v2429_v6, %v3712_v59  ;;  %v2447_v9 = vsel %vm734_vm3, %v2443_v33, 0.0 }
0x1208   : > { %2448 = vadd.xlane.f32.xlu0 %v2447_v9  ;;  %v3018_v12 = vpop.f32.mrf.mxu1 }
0x1209   : > { %v2444_v10 = vadd.f32 %v2769_v1, %v2434_v7 }
0x120b   : > { %v2450_v13 = vsel %vm734_vm3, %v2444_v10, 0.0 }
0x120c   : > { %2451 = vadd.xlane.f32.xlu1 %v2450_v13 }
0x1291   : > { %v2449_v14 = vpop.xlane.xlu0 %2448 }
0x1292   : > { %v2453_v18 = vmul.f32 0.03125, %v2449_v14 }
0x1294   : > { %v2455_v15 = vsub.f32 %v2443_v33, %v2453_v18 }
0x1295   : > { %v2452_v40 = vpop.xlane.xlu1 %2451 }
0x1296   : > { %v2454_v17 = vmul.f32 0.03125, %v2452_v40  ;;  %v2457_v19 = vmul.f32 %v2455_v15, %v2455_v15 }
0x1298   : > { %v2456_v56 = vsub.f32 %v2444_v10, %v2454_v17  ;;  %v2459_v20 = vsel %vm734_vm3, %v2457_v19, 0.0 }
0x1299   : > { %2460 = vadd.xlane.f32.xlu0 %v2459_v20 }
0x129a   : > { %v2458_v22 = vmul.f32 %v2456_v56, %v2456_v56 }
0x129c   : > { %v2462_v59 = vsel %vm734_vm3, %v2458_v22, 0.0 }
0x129d   : > { %2463 = vadd.xlane.f32.xlu1 %v2462_v59 }
0x1322   : > { %v2461_v25 = vpop.xlane.xlu0 %2460 }
0x1323   : > { %v2465_v26 = vmul.f32 0.03125, %v2461_v25 }
0x1325   : > { %v2467_v28 = vadd.f32 1e-05, %v2465_v26 }
0x1326   : > { %v2464_v30 = vpop.xlane.xlu1 %2463 }
0x1327   : > { %3165 = vrsqrt.f32 %v2467_v28  ;;  %v2466_v44 = vmul.f32 0.03125, %v2464_v30 }
0x1329   : > { %v2468_v31 = vadd.f32 1e-05, %v2466_v44 }
0x132b   : > { %3167 = vrsqrt.f32 %v2468_v31 }
0x1334   : > { %v3166_v32 = vpop.eup %3165 }
0x1335   : > { %v2471_v35 = vmul.f32 %v3166_v32, %v2455_v15 }
0x1337   : > { %v2479_v63 = vmul.f32 %v2770_v36, %v2471_v35 }
0x1338   : > { %v3168_v37 = vpop.eup %3167 }
0x1339   : > { %v2472_v61 = vmul.f32 %v3168_v37, %v2456_v56  ;;  %v2487_v39 = vadd.f32 %v2771_v2, %v2479_v63 }
0x133b   : > { %v2480_v38 = vmul.f32 %v2770_v36, %v2472_v61 }
0x133d   : > { %v2488_v41 = vadd.f32 %v2771_v2, %v2480_v38 }
0x133f   : > { %v2493_v5 = vpack.c.bf16 %v2488_v41, %v2487_v39 }
0x1341   : > { %3024 = vmatmul.mubr.msk.bf16.vlgmr.msra.gmra.mxu0 %vm734_vm3, %v2493_v5 }
0x1401   : > { %v2550_v43 = vpop.f32.mrf.mxu0 }
0x1402   : > { %v2551_v45 = vadd.f32 %v2772_v42, %v2550_v43 }
0x1403   : > { %v3025_v46 = vpop.f32.mrf.mxu0 }
0x1404   : > { %2558 = vst.msk [vmem:[%s631_s26] sm:$0xff] %vm2557_vm1, %v2551_v45 }
0x1405   : > { %v2553_v47 = vpop.f32.mrf.mxu0 }
0x1406   : > { %v2554_v48 = vadd.f32 %v2772_v42, %v2553_v47 }
0x1407   : > { %v3026_v49 = vpop.f32.mrf.mxu0 }
0x1408   : > { %2559 = vst.msk [vmem:[%s631_s26 + $0x8] sm:$0xff] %vm2557_vm1, %v2554_v48 }
0x1409 PF: > { %s32_s23 = sadd.s32 1, %s3175_s23  }
0x140a   : > { %p29_p4 = scmp.ge.s32.totalorder %s32_s23, 4  }
0x140c   :  { %31 = sbr.rel (!%p29_p4) target bundleno = 6 (0x6), region = 150 }

</bundles_post_ra>
